<compile_context>
chip_gen: v7x
topology: tpu7x:2x2x1
jax: 0.10.0
libtpu: 0.0.40
codegen_flags: <defaults>
</compile_context>

<pallas_src>
import functools
import numpy as np
import jax
import jax.numpy as jnp
from jax.experimental import pallas as pl
from jax.experimental.pallas import tpu as pltpu

# ----------------------------- model sizes (small, consistent with module) ---
VOCAB = 50
EMBED_DIM = 32
HIDDEN_DIM = 32
NUM_LAYERS = 2
OUTPUT_SIZE = 1
BATCH = 2
SEQ = 8


# ----------------------------- fused Pallas kernel ---------------------------
def _fused_sentiment_kernel(tok_ref, emb_ref,
                            wih0_ref, whh0_ref, b0_ref,
                            w1_ref, b1_ref,
                            h0_ref, c0_ref, fcw_ref, fcb_ref,
                            state_ref, sig_ref, *, T, B, H):
    f32 = jnp.float32
    V = emb_ref.shape[0]

    # ---- embedding gather as a one-hot matmul (time-major rows r = t*B + b) --------
    tok = tok_ref[...]                                                     # (T*B, 1) int32
    vocab_iota = jax.lax.broadcasted_iota(jnp.int32, (T * B, V), 1)
    onehot = (tok == vocab_iota).astype(f32)                               # (T*B, V)
    x_all = jnp.dot(onehot, emb_ref[...], preferred_element_type=f32)      # (T*B, E)

    # ---- hoisted layer-0 input projection (one matmul, off the recurrence path) ----
    # i/f/o columns of the weights/biases are pre-scaled by 0.5 at init (see
    # prepare_kernel_params) so a single tanh per step yields all gate nonlinearities.
    xproj0 = jnp.dot(x_all, wih0_ref[...], preferred_element_type=f32) + b0_ref[...]   # (T*B, 4H)

    # ---- hoisted constants ----------------------------------------------------------
    lane = jax.lax.broadcasted_iota(jnp.int32, (B, 4 * H), 1)
    g_mask = (lane >= 2 * H) & (lane < 3 * H)                              # g-gate lanes
    whh0 = whh0_ref[...]                                                   # (H, 4H)
    w1 = w1_ref[...]                                                       # (2H, 4H) = [Wih1^T ; Whh1^T]
    b1 = b1_ref[...]                                                       # (1, 4H)

    def gate_combine(gates, c_prev):
        # single transcendental for the four gate nonlinearities
        t = jnp.tanh(gates)                                                # whole-vreg tanh (EUP)
        act = jnp.where(g_mask, t, 0.5 * t + 0.5)                          # [i | f | g | o]
        # bring each gate block to lanes [0:H] via XLU rolls; offset-0 slices are cheap
        i_g = act[:, 0:H]
        f_g = pltpu.roll(act, shift=3 * H, axis=1)[:, 0:H]
        g_g = pltpu.roll(act, shift=2 * H, axis=1)[:, 0:H]
        o_g = pltpu.roll(act, shift=1 * H, axis=1)[:, 0:H]
        c_new = f_g * c_prev + i_g * g_g
        h_new = o_g * jnp.tanh(c_new)
        return h_new, c_new

    h0 = h0_ref[0].astype(f32); c0 = c0_ref[0].astype(f32)
    h1 = h0_ref[1].astype(f32); c1 = c0_ref[1].astype(f32)

    # ---- wavefront over both layers -------------------------------------------------
    # At wavefront step s: layer 1 computes time t = s-1 using h0_{s-1} (produced at step
    # s-1) and h1_{s-2}; layer 0 computes time t = s.  The two matmuls are independent.
    # TODO(synk): inter-layer LSTM dropout (p=0.5) and nn.Dropout are train-only; this
    #             implements eval-mode semantics (dropout = identity).
    for s in range(T + 1):
        if s >= 1:
            in1 = jnp.concatenate([h0, h1], axis=1)                        # (B, 2H); h0 == h0_{s-1}
            gates1 = jnp.dot(in1, w1, preferred_element_type=f32) + b1
            h1, c1 = gate_combine(gates1, c1)
        if s < T:
            gates0 = xproj0[s * B:(s + 1) * B, :] + \
                     jnp.dot(h0, whh0, preferred_element_type=f32)
            h0, c0 = gate_combine(gates0, c0)

    # ---- packed, lane-dense state output: (B, 4H) = (2, 128) = [h0 | c0 | h1 | c1] ---
    state_ref[...] = jnp.concatenate([h0, c0, h1, c1], axis=1).astype(state_ref.dtype)

    # ---- final Linear + Sigmoid on the top-layer last hidden state only --------------
    # sigmoid_output[:, -1] of the PyTorch module depends only on h_{T-1} of layer 1.
    z = jnp.sum(h1 * fcw_ref[...], axis=-1, keepdims=True) + fcb_ref[...]  # (B, 1)
    sig_ref[...] = jax.nn.sigmoid(z).astype(sig_ref.dtype)


# ----------------------------- forward (single pallas_call) ------------------
_VMEM_SPEC = functools.partial(pl.BlockSpec, memory_space=pltpu.MemorySpace.VMEM)


@jax.jit
def sentiment_forward(kparams, x_tokens, hidden):
    """x_tokens: (B, T) int32; hidden: ((L, B, H), (L, B, H)). Returns (sig (B,), new_hidden)."""
    B, T = x_tokens.shape
    H = HIDDEN_DIM
    h0_all, c0_all = hidden

    # tiny per-call glue: time-major flattened token column (row r = t*B + b)
    tok_col = x_tokens.T.reshape(T * B, 1).astype(jnp.int32)

    kernel = functools.partial(_fused_sentiment_kernel, T=T, B=B, H=H)

    state, sig = pl.pallas_call(
        kernel,
        out_shape=(
            jax.ShapeDtypeStruct((B, 4 * H), jnp.float32),   # [h0 | c0 | h1 | c1]
            jax.ShapeDtypeStruct((B, 1), jnp.float32),       # sigmoid_output[:, -1]
        ),
        in_specs=[_VMEM_SPEC()] * 11,
        out_specs=(_VMEM_SPEC(), _VMEM_SPEC()),
    )(tok_col, kparams["embedding"],
      kparams["wih0_t"], kparams["whh0_t"], kparams["b0"],
      kparams["w1_stacked"], kparams["b1"],
      h0_all, c0_all,
      kparams["fc_w"], kparams["fc_b"])

    hN = jnp.stack([state[:, 0:H], state[:, 2 * H:3 * H]], axis=0)
    cN = jnp.stack([state[:, H:2 * H], state[:, 3 * H:4 * H]], axis=0)
    return sig[:, 0], (hN, cN)


# ----------------------------- one-time kernel-weight preparation ------------
def prepare_kernel_params(params):
    """One-time layout work (kept OUT of the jitted per-call path):
    pre-transpose, stack layer-1 [Wih^T;Whh^T], pre-scale i/f/o gate columns by 0.5."""
    H = HIDDEN_DIM
    (w_ih0, w_hh0, b0), (w_ih1, w_hh1, b1) = params["lstm"]
    col = jnp.arange(4 * H)
    # g-gate columns keep scale 1.0; i/f/o columns scaled by 0.5 (sigmoid(x)=0.5*tanh(x/2)+0.5)
    scale = jnp.where((col >= 2 * H) & (col < 3 * H), 1.0, 0.5).astype(jnp.float32)[None, :]
    kp = {
        "embedding": params["embedding"],                                   # (V, E)
        "wih0_t": (w_ih0.T * scale).astype(jnp.float32),                    # (E, 4H)
        "whh0_t": (w_hh0.T * scale).astype(jnp.float32),                    # (H, 4H)
        "b0": (b0 * scale).astype(jnp.float32),                             # (1, 4H)
        "w1_stacked": (jnp.concatenate([w_ih1.T, w_hh1.T], axis=0) * scale
                       ).astype(jnp.float32),                               # (2H, 4H)
        "b1": (b1 * scale).astype(jnp.float32),                             # (1, 4H)
        "fc_w": params["fc_w"].astype(jnp.float32),                         # (1, H)
        "fc_b": params["fc_b"].reshape(1, 1).astype(jnp.float32),           # (1, 1)
    }
    return kp


# ----------------------------- parameter init (deterministic) ----------------
def init_params(key):
    k = 1.0 / np.sqrt(HIDDEN_DIM)
    keys = jax.random.split(key, 2 + 3 * NUM_LAYERS + 2)
    params = {}
    params["embedding"] = jax.random.normal(keys[0], (VOCAB, EMBED_DIM), jnp.float32)
    lstm = []
    idx = 1
    for layer in range(NUM_LAYERS):
        in_dim = EMBED_DIM if layer == 0 else HIDDEN_DIM
        w_ih = jax.random.uniform(keys[idx], (4 * HIDDEN_DIM, in_dim), jnp.float32, -k, k); idx += 1
        w_hh = jax.random.uniform(keys[idx], (4 * HIDDEN_DIM, HIDDEN_DIM), jnp.float32, -k, k); idx += 1
        # NOTE: combined (b_ih + b_hh) drawn as a single U(-k,k); when importing real PyTorch
        # weights, pass b_ih + b_hh here.
        b = jax.random.uniform(keys[idx], (1, 4 * HIDDEN_DIM), jnp.float32, -k, k); idx += 1
        lstm.append((w_ih, w_hh, b))
    params["lstm"] = lstm
    params["fc_w"] = jax.random.uniform(keys[idx], (OUTPUT_SIZE, HIDDEN_DIM), jnp.float32, -k, k); idx += 1
    params["fc_b"] = jax.random.uniform(keys[idx], (OUTPUT_SIZE,), jnp.float32, -k, k)
    return params


# ----------------------------- pure-JAX reference -----------------------------
def ref_forward(params, x_tokens, hidden):
    B, T = x_tokens.shape
    H = HIDDEN_DIM
    h_all, c_all = hidden
    layer_in = jnp.take(params["embedding"], x_tokens, axis=0)   # (B, T, E)
    new_h, new_c = [], []
    for layer in range(NUM_LAYERS):
        w_ih, w_hh, b = params["lstm"][layer]
        h = h_all[layer]
        c = c_all[layer]
        outs = []
        for t in range(T):
            x_t = layer_in[:, t, :]
            gates = x_t @ w_ih.T + h @ w_hh.T + b
            i_g = jax.nn.sigmoid(gates[:, :H])
            f_g = jax.nn.sigmoid(gates[:, H:2 * H])
            g_g = jnp.tanh(gates[:, 2 * H:3 * H])
            o_g = jax.nn.sigmoid(gates[:, 3 * H:])
            c = f_g * c + i_g * g_g
            h = o_g * jnp.tanh(c)
            outs.append(h)
        layer_in = jnp.stack(outs, axis=1)
        new_h.append(h)
        new_c.append(c)
    flat = layer_in.reshape(-1, H)
    out = jax.nn.sigmoid(flat @ params["fc_w"].T + params["fc_b"])
    sig = out.reshape(B, -1)[:, -1]
    return sig, (jnp.stack(new_h), jnp.stack(new_c))


# ----------------------------- main -------------------------------------------
if __name__ == "__main__":
    key = jax.random.PRNGKey(0)
    pkey, xkey = jax.random.split(key)
    params = init_params(pkey)
    kparams = prepare_kernel_params(params)      # one-time layout prep, outside jit

    x_tokens = jax.random.randint(xkey, (BATCH, SEQ), 0, VOCAB, dtype=jnp.int32)
    hidden = (jnp.zeros((NUM_LAYERS, BATCH, HIDDEN_DIM), jnp.float32),
              jnp.zeros((NUM_LAYERS, BATCH, HIDDEN_DIM), jnp.float32))

    sig, (h_new, c_new) = sentiment_forward(kparams, x_tokens, hidden)
    sig = jax.block_until_ready(sig)
    h_new = jax.block_until_ready(h_new)
    c_new = jax.block_until_ready(c_new)

    sig_ref, (h_ref, c_ref) = ref_forward(params, x_tokens, hidden)

    assert sig.shape == (BATCH,)
    assert h_new.shape == (NUM_LAYERS, BATCH, HIDDEN_DIM)
    assert c_new.shape == (NUM_LAYERS, BATCH, HIDDEN_DIM)
    # tanh-based sigmoid differs from the exp-based logistic by a few ulps -> slightly
    # relaxed rtol, same atol.
    np.testing.assert_allclose(np.asarray(sig), np.asarray(sig_ref), rtol=1e-4, atol=1e-5)
    np.testing.assert_allclose(np.asarray(h_new), np.asarray(h_ref), rtol=1e-4, atol=1e-5)
    np.testing.assert_allclose(np.asarray(c_new), np.asarray(c_ref), rtol=1e-4, atol=1e-5)

    print("KERNEL_OK")
</pallas_src>

<mosaic_0001>
module attributes {stable_mosaic.version = 11 : i64} {
  func.func @_fused_sentiment_kernel(%arg0: memref<16x1xi32, #tpu.memory_space<vmem>>, %arg1: memref<50x32xf32, #tpu.memory_space<vmem>>, %arg2: memref<32x128xf32, #tpu.memory_space<vmem>>, %arg3: memref<32x128xf32, #tpu.memory_space<vmem>>, %arg4: memref<1x128xf32, #tpu.memory_space<vmem>>, %arg5: memref<64x128xf32, #tpu.memory_space<vmem>>, %arg6: memref<1x128xf32, #tpu.memory_space<vmem>>, %arg7: memref<2x2x32xf32, #tpu.memory_space<vmem>>, %arg8: memref<2x2x32xf32, #tpu.memory_space<vmem>>, %arg9: memref<1x32xf32, #tpu.memory_space<vmem>>, %arg10: memref<1x1xf32, #tpu.memory_space<vmem>>, %arg11: memref<2x128xf32, #tpu.memory_space<vmem>>, %arg12: memref<2x1xf32, #tpu.memory_space<vmem>>) attributes {dimension_semantics = [], scalar_prefetch = 0 : i64, scratch_operands = 0 : i64, tpu.core_type = #tpu.core_type<tc>} {
    %c0 = arith.constant 0 : index
    %c0_0 = arith.constant 0 : index
    %0 = vector.load %arg0[%c0, %c0_0] : memref<16x1xi32, #tpu.memory_space<vmem>>, vector<16x1xi32>
    %1 = tpu.iota {dimensions = array<i32: 1>} : vector<16x50xi32>
    %2 = vector.broadcast %0 : vector<16x1xi32> to vector<16x50xi32>
    %3 = arith.cmpi eq, %2, %1 : vector<16x50xi32>
    %4 = arith.extui %3 : vector<16x50xi1> to vector<16x50xi32>
    %5 = arith.sitofp %4 : vector<16x50xi32> to vector<16x50xf32>
    %c0_1 = arith.constant 0 : index
    %c0_2 = arith.constant 0 : index
    %6 = vector.load %arg1[%c0_1, %c0_2] : memref<50x32xf32, #tpu.memory_space<vmem>>, vector<50x32xf32>
    %cst = arith.constant dense<0.000000e+00> : vector<16x32xf32>
    %7 = tpu.matmul %5, %6, %cst {dimension_numbers = #tpu.dot_dimension_numbers<[1], [0], [0], [1], [0, 0, 1, 1], [], []>} : vector<16x50xf32>, vector<50x32xf32>, vector<16x32xf32> -> vector<16x32xf32>
    %c0_3 = arith.constant 0 : index
    %c0_4 = arith.constant 0 : index
    %8 = vector.load %arg2[%c0_3, %c0_4] : memref<32x128xf32, #tpu.memory_space<vmem>>, vector<32x128xf32>
    %cst_5 = arith.constant dense<0.000000e+00> : vector<16x128xf32>
    %9 = tpu.matmul %7, %8, %cst_5 {dimension_numbers = #tpu.dot_dimension_numbers<[1], [0], [0], [1], [0, 0, 1, 1], [], []>} : vector<16x32xf32>, vector<32x128xf32>, vector<16x128xf32> -> vector<16x128xf32>
    %c0_6 = arith.constant 0 : index
    %c0_7 = arith.constant 0 : index
    %10 = vector.load %arg4[%c0_6, %c0_7] : memref<1x128xf32, #tpu.memory_space<vmem>>, vector<1x128xf32>
    %11 = vector.broadcast %10 : vector<1x128xf32> to vector<16x128xf32>
    %12 = arith.addf %9, %11 : vector<16x128xf32>
    %13 = tpu.iota {dimensions = array<i32: 1>} : vector<2x128xi32>
    %c64_i32 = arith.constant 64 : i32
    %14 = vector.broadcast %c64_i32 : i32 to vector<2x128xi32>
    %15 = arith.cmpi sge, %13, %14 : vector<2x128xi32>
    %c96_i32 = arith.constant 96 : i32
    %16 = vector.broadcast %c96_i32 : i32 to vector<2x128xi32>
    %17 = arith.cmpi slt, %13, %16 : vector<2x128xi32>
    %18 = arith.andi %15, %17 : vector<2x128xi1>
    %c0_8 = arith.constant 0 : index
    %c0_9 = arith.constant 0 : index
    %19 = vector.load %arg3[%c0_8, %c0_9] : memref<32x128xf32, #tpu.memory_space<vmem>>, vector<32x128xf32>
    %c0_10 = arith.constant 0 : index
    %c0_11 = arith.constant 0 : index
    %20 = vector.load %arg5[%c0_10, %c0_11] : memref<64x128xf32, #tpu.memory_space<vmem>>, vector<64x128xf32>
    %c0_12 = arith.constant 0 : index
    %c0_13 = arith.constant 0 : index
    %21 = vector.load %arg6[%c0_12, %c0_13] : memref<1x128xf32, #tpu.memory_space<vmem>>, vector<1x128xf32>
    %c0_14 = arith.constant 0 : index
    %c0_15 = arith.constant 0 : index
    %c0_16 = arith.constant 0 : index
    %22 = vector.load %arg7[%c0_14, %c0_15, %c0_16] : memref<2x2x32xf32, #tpu.memory_space<vmem>>, vector<1x2x32xf32>
    %23 = vector.shape_cast %22 : vector<1x2x32xf32> to vector<2x32xf32>
    %c0_17 = arith.constant 0 : index
    %c0_18 = arith.constant 0 : index
    %c0_19 = arith.constant 0 : index
    %24 = vector.load %arg8[%c0_17, %c0_18, %c0_19] : memref<2x2x32xf32, #tpu.memory_space<vmem>>, vector<1x2x32xf32>
    %25 = vector.shape_cast %24 : vector<1x2x32xf32> to vector<2x32xf32>
    %c1 = arith.constant 1 : index
    %c0_20 = arith.constant 0 : index
    %c0_21 = arith.constant 0 : index
    %26 = vector.load %arg7[%c1, %c0_20, %c0_21] : memref<2x2x32xf32, #tpu.memory_space<vmem>>, vector<1x2x32xf32>
    %27 = vector.shape_cast %26 : vector<1x2x32xf32> to vector<2x32xf32>
    %c1_22 = arith.constant 1 : index
    %c0_23 = arith.constant 0 : index
    %c0_24 = arith.constant 0 : index
    %28 = vector.load %arg8[%c1_22, %c0_23, %c0_24] : memref<2x2x32xf32, #tpu.memory_space<vmem>>, vector<1x2x32xf32>
    %29 = vector.shape_cast %28 : vector<1x2x32xf32> to vector<2x32xf32>
    %30 = vector.extract_strided_slice %12 {offsets = [0, 0], sizes = [2, 128], strides = [1, 1]} : vector<16x128xf32> to vector<2x128xf32>
    %cst_25 = arith.constant dense<0.000000e+00> : vector<2x128xf32>
    %31 = tpu.matmul %23, %19, %cst_25 {dimension_numbers = #tpu.dot_dimension_numbers<[1], [0], [0], [1], [0, 0, 1, 1], [], []>} : vector<2x32xf32>, vector<32x128xf32>, vector<2x128xf32> -> vector<2x128xf32>
    %32 = arith.addf %30, %31 : vector<2x128xf32>
    %33 = math.tanh %32 : vector<2x128xf32>
    %cst_26 = arith.constant 5.000000e-01 : f32
    %34 = vector.broadcast %cst_26 : f32 to vector<2x128xf32>
    %35 = arith.mulf %34, %33 : vector<2x128xf32>
    %cst_27 = arith.constant 5.000000e-01 : f32
    %36 = vector.broadcast %cst_27 : f32 to vector<2x128xf32>
    %37 = arith.addf %35, %36 : vector<2x128xf32>
    %38 = arith.select %18, %33, %37 : vector<2x128xi1>, vector<2x128xf32>
    %39 = vector.extract_strided_slice %38 {offsets = [0, 0], sizes = [2, 32], strides = [1, 1]} : vector<2x128xf32> to vector<2x32xf32>
    %c96_i32_28 = arith.constant 96 : i32
    %40 = tpu.dynamic_rotate %38 by %c96_i32_28 dim 1 : vector<2x128xf32>, i32 -> vector<2x128xf32>
    %41 = vector.extract_strided_slice %40 {offsets = [0, 0], sizes = [2, 32], strides = [1, 1]} : vector<2x128xf32> to vector<2x32xf32>
    %c64_i32_29 = arith.constant 64 : i32
    %42 = tpu.dynamic_rotate %38 by %c64_i32_29 dim 1 : vector<2x128xf32>, i32 -> vector<2x128xf32>
    %43 = vector.extract_strided_slice %42 {offsets = [0, 0], sizes = [2, 32], strides = [1, 1]} : vector<2x128xf32> to vector<2x32xf32>
    %c32_i32 = arith.constant 32 : i32
    %44 = tpu.dynamic_rotate %38 by %c32_i32 dim 1 : vector<2x128xf32>, i32 -> vector<2x128xf32>
    %45 = vector.extract_strided_slice %44 {offsets = [0, 0], sizes = [2, 32], strides = [1, 1]} : vector<2x128xf32> to vector<2x32xf32>
    %46 = arith.mulf %41, %25 : vector<2x32xf32>
    %47 = arith.mulf %39, %43 : vector<2x32xf32>
    %48 = arith.addf %46, %47 : vector<2x32xf32>
    %49 = math.tanh %48 : vector<2x32xf32>
    %50 = arith.mulf %45, %49 : vector<2x32xf32>
    %51 = tpu.concatenate %50, %27 in 1 : vector<2x32xf32>, vector<2x32xf32> -> vector<2x64xf32>
    %cst_30 = arith.constant dense<0.000000e+00> : vector<2x128xf32>
    %52 = tpu.matmul %51, %20, %cst_30 {dimension_numbers = #tpu.dot_dimension_numbers<[1], [0], [0], [1], [0, 0, 1, 1], [], []>} : vector<2x64xf32>, vector<64x128xf32>, vector<2x128xf32> -> vector<2x128xf32>
    %53 = vector.broadcast %21 : vector<1x128xf32> to vector<2x128xf32>
    %54 = arith.addf %52, %53 : vector<2x128xf32>
    %55 = math.tanh %54 : vector<2x128xf32>
    %cst_31 = arith.constant 5.000000e-01 : f32
    %56 = vector.broadcast %cst_31 : f32 to vector<2x128xf32>
    %57 = arith.mulf %56, %55 : vector<2x128xf32>
    %cst_32 = arith.constant 5.000000e-01 : f32
    %58 = vector.broadcast %cst_32 : f32 to vector<2x128xf32>
    %59 = arith.addf %57, %58 : vector<2x128xf32>
    %60 = arith.select %18, %55, %59 : vector<2x128xi1>, vector<2x128xf32>
    %61 = vector.extract_strided_slice %60 {offsets = [0, 0], sizes = [2, 32], strides = [1, 1]} : vector<2x128xf32> to vector<2x32xf32>
    %c96_i32_33 = arith.constant 96 : i32
    %62 = tpu.dynamic_rotate %60 by %c96_i32_33 dim 1 : vector<2x128xf32>, i32 -> vector<2x128xf32>
    %63 = vector.extract_strided_slice %62 {offsets = [0, 0], sizes = [2, 32], strides = [1, 1]} : vector<2x128xf32> to vector<2x32xf32>
    %c64_i32_34 = arith.constant 64 : i32
    %64 = tpu.dynamic_rotate %60 by %c64_i32_34 dim 1 : vector<2x128xf32>, i32 -> vector<2x128xf32>
    %65 = vector.extract_strided_slice %64 {offsets = [0, 0], sizes = [2, 32], strides = [1, 1]} : vector<2x128xf32> to vector<2x32xf32>
    %c32_i32_35 = arith.constant 32 : i32
    %66 = tpu.dynamic_rotate %60 by %c32_i32_35 dim 1 : vector<2x128xf32>, i32 -> vector<2x128xf32>
    %67 = vector.extract_strided_slice %66 {offsets = [0, 0], sizes = [2, 32], strides = [1, 1]} : vector<2x128xf32> to vector<2x32xf32>
    %68 = arith.mulf %63, %29 : vector<2x32xf32>
    %69 = arith.mulf %61, %65 : vector<2x32xf32>
    %70 = arith.addf %68, %69 : vector<2x32xf32>
    %71 = math.tanh %70 : vector<2x32xf32>
    %72 = arith.mulf %67, %71 : vector<2x32xf32>
    %73 = vector.extract_strided_slice %12 {offsets = [2, 0], sizes = [2, 128], strides = [1, 1]} : vector<16x128xf32> to vector<2x128xf32>
    %cst_36 = arith.constant dense<0.000000e+00> : vector<2x128xf32>
    %74 = tpu.matmul %50, %19, %cst_36 {dimension_numbers = #tpu.dot_dimension_numbers<[1], [0], [0], [1], [0, 0, 1, 1], [], []>} : vector<2x32xf32>, vector<32x128xf32>, vector<2x128xf32> -> vector<2x128xf32>
    %75 = arith.addf %73, %74 : vector<2x128xf32>
    %76 = math.tanh %75 : vector<2x128xf32>
    %cst_37 = arith.constant 5.000000e-01 : f32
    %77 = vector.broadcast %cst_37 : f32 to vector<2x128xf32>
    %78 = arith.mulf %77, %76 : vector<2x128xf32>
    %cst_38 = arith.constant 5.000000e-01 : f32
    %79 = vector.broadcast %cst_38 : f32 to vector<2x128xf32>
    %80 = arith.addf %78, %79 : vector<2x128xf32>
    %81 = arith.select %18, %76, %80 : vector<2x128xi1>, vector<2x128xf32>
    %82 = vector.extract_strided_slice %81 {offsets = [0, 0], sizes = [2, 32], strides = [1, 1]} : vector<2x128xf32> to vector<2x32xf32>
    %c96_i32_39 = arith.constant 96 : i32
    %83 = tpu.dynamic_rotate %81 by %c96_i32_39 dim 1 : vector<2x128xf32>, i32 -> vector<2x128xf32>
    %84 = vector.extract_strided_slice %83 {offsets = [0, 0], sizes = [2, 32], strides = [1, 1]} : vector<2x128xf32> to vector<2x32xf32>
    %c64_i32_40 = arith.constant 64 : i32
    %85 = tpu.dynamic_rotate %81 by %c64_i32_40 dim 1 : vector<2x128xf32>, i32 -> vector<2x128xf32>
    %86 = vector.extract_strided_slice %85 {offsets = [0, 0], sizes = [2, 32], strides = [1, 1]} : vector<2x128xf32> to vector<2x32xf32>
    %c32_i32_41 = arith.constant 32 : i32
    %87 = tpu.dynamic_rotate %81 by %c32_i32_41 dim 1 : vector<2x128xf32>, i32 -> vector<2x128xf32>
    %88 = vector.extract_strided_slice %87 {offsets = [0, 0], sizes = [2, 32], strides = [1, 1]} : vector<2x128xf32> to vector<2x32xf32>
    %89 = arith.mulf %84, %48 : vector<2x32xf32>
    %90 = arith.mulf %82, %86 : vector<2x32xf32>
    %91 = arith.addf %89, %90 : vector<2x32xf32>
    %92 = math.tanh %91 : vector<2x32xf32>
    %93 = arith.mulf %88, %92 : vector<2x32xf32>
    %94 = tpu.concatenate %93, %72 in 1 : vector<2x32xf32>, vector<2x32xf32> -> vector<2x64xf32>
    %cst_42 = arith.constant dense<0.000000e+00> : vector<2x128xf32>
    %95 = tpu.matmul %94, %20, %cst_42 {dimension_numbers = #tpu.dot_dimension_numbers<[1], [0], [0], [1], [0, 0, 1, 1], [], []>} : vector<2x64xf32>, vector<64x128xf32>, vector<2x128xf32> -> vector<2x128xf32>
    %96 = vector.broadcast %21 : vector<1x128xf32> to vector<2x128xf32>
    %97 = arith.addf %95, %96 : vector<2x128xf32>
    %98 = math.tanh %97 : vector<2x128xf32>
    %cst_43 = arith.constant 5.000000e-01 : f32
    %99 = vector.broadcast %cst_43 : f32 to vector<2x128xf32>
    %100 = arith.mulf %99, %98 : vector<2x128xf32>
    %cst_44 = arith.constant 5.000000e-01 : f32
    %101 = vector.broadcast %cst_44 : f32 to vector<2x128xf32>
    %102 = arith.addf %100, %101 : vector<2x128xf32>
    %103 = arith.select %18, %98, %102 : vector<2x128xi1>, vector<2x128xf32>
    %104 = vector.extract_strided_slice %103 {offsets = [0, 0], sizes = [2, 32], strides = [1, 1]} : vector<2x128xf32> to vector<2x32xf32>
    %c96_i32_45 = arith.constant 96 : i32
    %105 = tpu.dynamic_rotate %103 by %c96_i32_45 dim 1 : vector<2x128xf32>, i32 -> vector<2x128xf32>
    %106 = vector.extract_strided_slice %105 {offsets = [0, 0], sizes = [2, 32], strides = [1, 1]} : vector<2x128xf32> to vector<2x32xf32>
    %c64_i32_46 = arith.constant 64 : i32
    %107 = tpu.dynamic_rotate %103 by %c64_i32_46 dim 1 : vector<2x128xf32>, i32 -> vector<2x128xf32>
    %108 = vector.extract_strided_slice %107 {offsets = [0, 0], sizes = [2, 32], strides = [1, 1]} : vector<2x128xf32> to vector<2x32xf32>
    %c32_i32_47 = arith.constant 32 : i32
    %109 = tpu.dynamic_rotate %103 by %c32_i32_47 dim 1 : vector<2x128xf32>, i32 -> vector<2x128xf32>
    %110 = vector.extract_strided_slice %109 {offsets = [0, 0], sizes = [2, 32], strides = [1, 1]} : vector<2x128xf32> to vector<2x32xf32>
    %111 = arith.mulf %106, %70 : vector<2x32xf32>
    %112 = arith.mulf %104, %108 : vector<2x32xf32>
    %113 = arith.addf %111, %112 : vector<2x32xf32>
    %114 = math.tanh %113 : vector<2x32xf32>
    %115 = arith.mulf %110, %114 : vector<2x32xf32>
    %116 = vector.extract_strided_slice %12 {offsets = [4, 0], sizes = [2, 128], strides = [1, 1]} : vector<16x128xf32> to vector<2x128xf32>
    %cst_48 = arith.constant dense<0.000000e+00> : vector<2x128xf32>
    %117 = tpu.matmul %93, %19, %cst_48 {dimension_numbers = #tpu.dot_dimension_numbers<[1], [0], [0], [1], [0, 0, 1, 1], [], []>} : vector<2x32xf32>, vector<32x128xf32>, vector<2x128xf32> -> vector<2x128xf32>
    %118 = arith.addf %116, %117 : vector<2x128xf32>
    %119 = math.tanh %118 : vector<2x128xf32>
    %cst_49 = arith.constant 5.000000e-01 : f32
    %120 = vector.broadcast %cst_49 : f32 to vector<2x128xf32>
    %121 = arith.mulf %120, %119 : vector<2x128xf32>
    %cst_50 = arith.constant 5.000000e-01 : f32
    %122 = vector.broadcast %cst_50 : f32 to vector<2x128xf32>
    %123 = arith.addf %121, %122 : vector<2x128xf32>
    %124 = arith.select %18, %119, %123 : vector<2x128xi1>, vector<2x128xf32>
    %125 = vector.extract_strided_slice %124 {offsets = [0, 0], sizes = [2, 32], strides = [1, 1]} : vector<2x128xf32> to vector<2x32xf32>
    %c96_i32_51 = arith.constant 96 : i32
    %126 = tpu.dynamic_rotate %124 by %c96_i32_51 dim 1 : vector<2x128xf32>, i32 -> vector<2x128xf32>
    %127 = vector.extract_strided_slice %126 {offsets = [0, 0], sizes = [2, 32], strides = [1, 1]} : vector<2x128xf32> to vector<2x32xf32>
    %c64_i32_52 = arith.constant 64 : i32
    %128 = tpu.dynamic_rotate %124 by %c64_i32_52 dim 1 : vector<2x128xf32>, i32 -> vector<2x128xf32>
    %129 = vector.extract_strided_slice %128 {offsets = [0, 0], sizes = [2, 32], strides = [1, 1]} : vector<2x128xf32> to vector<2x32xf32>
    %c32_i32_53 = arith.constant 32 : i32
    %130 = tpu.dynamic_rotate %124 by %c32_i32_53 dim 1 : vector<2x128xf32>, i32 -> vector<2x128xf32>
    %131 = vector.extract_strided_slice %130 {offsets = [0, 0], sizes = [2, 32], strides = [1, 1]} : vector<2x128xf32> to vector<2x32xf32>
    %132 = arith.mulf %127, %91 : vector<2x32xf32>
    %133 = arith.mulf %125, %129 : vector<2x32xf32>
    %134 = arith.addf %132, %133 : vector<2x32xf32>
    %135 = math.tanh %134 : vector<2x32xf32>
    %136 = arith.mulf %131, %135 : vector<2x32xf32>
    %137 = tpu.concatenate %136, %115 in 1 : vector<2x32xf32>, vector<2x32xf32> -> vector<2x64xf32>
    %cst_54 = arith.constant dense<0.000000e+00> : vector<2x128xf32>
    %138 = tpu.matmul %137, %20, %cst_54 {dimension_numbers = #tpu.dot_dimension_numbers<[1], [0], [0], [1], [0, 0, 1, 1], [], []>} : vector<2x64xf32>, vector<64x128xf32>, vector<2x128xf32> -> vector<2x128xf32>
    %139 = vector.broadcast %21 : vector<1x128xf32> to vector<2x128xf32>
    %140 = arith.addf %138, %139 : vector<2x128xf32>
    %141 = math.tanh %140 : vector<2x128xf32>
    %cst_55 = arith.constant 5.000000e-01 : f32
    %142 = vector.broadcast %cst_55 : f32 to vector<2x128xf32>
    %143 = arith.mulf %142, %141 : vector<2x128xf32>
    %cst_56 = arith.constant 5.000000e-01 : f32
    %144 = vector.broadcast %cst_56 : f32 to vector<2x128xf32>
    %145 = arith.addf %143, %144 : vector<2x128xf32>
    %146 = arith.select %18, %141, %145 : vector<2x128xi1>, vector<2x128xf32>
    %147 = vector.extract_strided_slice %146 {offsets = [0, 0], sizes = [2, 32], strides = [1, 1]} : vector<2x128xf32> to vector<2x32xf32>
    %c96_i32_57 = arith.constant 96 : i32
    %148 = tpu.dynamic_rotate %146 by %c96_i32_57 dim 1 : vector<2x128xf32>, i32 -> vector<2x128xf32>
    %149 = vector.extract_strided_slice %148 {offsets = [0, 0], sizes = [2, 32], strides = [1, 1]} : vector<2x128xf32> to vector<2x32xf32>
    %c64_i32_58 = arith.constant 64 : i32
    %150 = tpu.dynamic_rotate %146 by %c64_i32_58 dim 1 : vector<2x128xf32>, i32 -> vector<2x128xf32>
    %151 = vector.extract_strided_slice %150 {offsets = [0, 0], sizes = [2, 32], strides = [1, 1]} : vector<2x128xf32> to vector<2x32xf32>
    %c32_i32_59 = arith.constant 32 : i32
    %152 = tpu.dynamic_rotate %146 by %c32_i32_59 dim 1 : vector<2x128xf32>, i32 -> vector<2x128xf32>
    %153 = vector.extract_strided_slice %152 {offsets = [0, 0], sizes = [2, 32], strides = [1, 1]} : vector<2x128xf32> to vector<2x32xf32>
    %154 = arith.mulf %149, %113 : vector<2x32xf32>
    %155 = arith.mulf %147, %151 : vector<2x32xf32>
    %156 = arith.addf %154, %155 : vector<2x32xf32>
    %157 = math.tanh %156 : vector<2x32xf32>
    %158 = arith.mulf %153, %157 : vector<2x32xf32>
    %159 = vector.extract_strided_slice %12 {offsets = [6, 0], sizes = [2, 128], strides = [1, 1]} : vector<16x128xf32> to vector<2x128xf32>
    %cst_60 = arith.constant dense<0.000000e+00> : vector<2x128xf32>
    %160 = tpu.matmul %136, %19, %cst_60 {dimension_numbers = #tpu.dot_dimension_numbers<[1], [0], [0], [1], [0, 0, 1, 1], [], []>} : vector<2x32xf32>, vector<32x128xf32>, vector<2x128xf32> -> vector<2x128xf32>
    %161 = arith.addf %159, %160 : vector<2x128xf32>
    %162 = math.tanh %161 : vector<2x128xf32>
    %cst_61 = arith.constant 5.000000e-01 : f32
    %163 = vector.broadcast %cst_61 : f32 to vector<2x128xf32>
    %164 = arith.mulf %163, %162 : vector<2x128xf32>
    %cst_62 = arith.constant 5.000000e-01 : f32
    %165 = vector.broadcast %cst_62 : f32 to vector<2x128xf32>
    %166 = arith.addf %164, %165 : vector<2x128xf32>
    %167 = arith.select %18, %162, %166 : vector<2x128xi1>, vector<2x128xf32>
    %168 = vector.extract_strided_slice %167 {offsets = [0, 0], sizes = [2, 32], strides = [1, 1]} : vector<2x128xf32> to vector<2x32xf32>
    %c96_i32_63 = arith.constant 96 : i32
    %169 = tpu.dynamic_rotate %167 by %c96_i32_63 dim 1 : vector<2x128xf32>, i32 -> vector<2x128xf32>
    %170 = vector.extract_strided_slice %169 {offsets = [0, 0], sizes = [2, 32], strides = [1, 1]} : vector<2x128xf32> to vector<2x32xf32>
    %c64_i32_64 = arith.constant 64 : i32
    %171 = tpu.dynamic_rotate %167 by %c64_i32_64 dim 1 : vector<2x128xf32>, i32 -> vector<2x128xf32>
    %172 = vector.extract_strided_slice %171 {offsets = [0, 0], sizes = [2, 32], strides = [1, 1]} : vector<2x128xf32> to vector<2x32xf32>
    %c32_i32_65 = arith.constant 32 : i32
    %173 = tpu.dynamic_rotate %167 by %c32_i32_65 dim 1 : vector<2x128xf32>, i32 -> vector<2x128xf32>
    %174 = vector.extract_strided_slice %173 {offsets = [0, 0], sizes = [2, 32], strides = [1, 1]} : vector<2x128xf32> to vector<2x32xf32>
    %175 = arith.mulf %170, %134 : vector<2x32xf32>
    %176 = arith.mulf %168, %172 : vector<2x32xf32>
    %177 = arith.addf %175, %176 : vector<2x32xf32>
    %178 = math.tanh %177 : vector<2x32xf32>
    %179 = arith.mulf %174, %178 : vector<2x32xf32>
    %180 = tpu.concatenate %179, %158 in 1 : vector<2x32xf32>, vector<2x32xf32> -> vector<2x64xf32>
    %cst_66 = arith.constant dense<0.000000e+00> : vector<2x128xf32>
    %181 = tpu.matmul %180, %20, %cst_66 {dimension_numbers = #tpu.dot_dimension_numbers<[1], [0], [0], [1], [0, 0, 1, 1], [], []>} : vector<2x64xf32>, vector<64x128xf32>, vector<2x128xf32> -> vector<2x128xf32>
    %182 = vector.broadcast %21 : vector<1x128xf32> to vector<2x128xf32>
    %183 = arith.addf %181, %182 : vector<2x128xf32>
    %184 = math.tanh %183 : vector<2x128xf32>
    %cst_67 = arith.constant 5.000000e-01 : f32
    %185 = vector.broadcast %cst_67 : f32 to vector<2x128xf32>
    %186 = arith.mulf %185, %184 : vector<2x128xf32>
    %cst_68 = arith.constant 5.000000e-01 : f32
    %187 = vector.broadcast %cst_68 : f32 to vector<2x128xf32>
    %188 = arith.addf %186, %187 : vector<2x128xf32>
    %189 = arith.select %18, %184, %188 : vector<2x128xi1>, vector<2x128xf32>
    %190 = vector.extract_strided_slice %189 {offsets = [0, 0], sizes = [2, 32], strides = [1, 1]} : vector<2x128xf32> to vector<2x32xf32>
    %c96_i32_69 = arith.constant 96 : i32
    %191 = tpu.dynamic_rotate %189 by %c96_i32_69 dim 1 : vector<2x128xf32>, i32 -> vector<2x128xf32>
    %192 = vector.extract_strided_slice %191 {offsets = [0, 0], sizes = [2, 32], strides = [1, 1]} : vector<2x128xf32> to vector<2x32xf32>
    %c64_i32_70 = arith.constant 64 : i32
    %193 = tpu.dynamic_rotate %189 by %c64_i32_70 dim 1 : vector<2x128xf32>, i32 -> vector<2x128xf32>
    %194 = vector.extract_strided_slice %193 {offsets = [0, 0], sizes = [2, 32], strides = [1, 1]} : vector<2x128xf32> to vector<2x32xf32>
    %c32_i32_71 = arith.constant 32 : i32
    %195 = tpu.dynamic_rotate %189 by %c32_i32_71 dim 1 : vector<2x128xf32>, i32 -> vector<2x128xf32>
    %196 = vector.extract_strided_slice %195 {offsets = [0, 0], sizes = [2, 32], strides = [1, 1]} : vector<2x128xf32> to vector<2x32xf32>
    %197 = arith.mulf %192, %156 : vector<2x32xf32>
    %198 = arith.mulf %190, %194 : vector<2x32xf32>
    %199 = arith.addf %197, %198 : vector<2x32xf32>
    %200 = math.tanh %199 : vector<2x32xf32>
    %201 = arith.mulf %196, %200 : vector<2x32xf32>
    %202 = vector.extract_strided_slice %12 {offsets = [8, 0], sizes = [2, 128], strides = [1, 1]} : vector<16x128xf32> to vector<2x128xf32>
    %cst_72 = arith.constant dense<0.000000e+00> : vector<2x128xf32>
    %203 = tpu.matmul %179, %19, %cst_72 {dimension_numbers = #tpu.dot_dimension_numbers<[1], [0], [0], [1], [0, 0, 1, 1], [], []>} : vector<2x32xf32>, vector<32x128xf32>, vector<2x128xf32> -> vector<2x128xf32>
    %204 = arith.addf %202, %203 : vector<2x128xf32>
    %205 = math.tanh %204 : vector<2x128xf32>
    %cst_73 = arith.constant 5.000000e-01 : f32
    %206 = vector.broadcast %cst_73 : f32 to vector<2x128xf32>
    %207 = arith.mulf %206, %205 : vector<2x128xf32>
    %cst_74 = arith.constant 5.000000e-01 : f32
    %208 = vector.broadcast %cst_74 : f32 to vector<2x128xf32>
    %209 = arith.addf %207, %208 : vector<2x128xf32>
    %210 = arith.select %18, %205, %209 : vector<2x128xi1>, vector<2x128xf32>
    %211 = vector.extract_strided_slice %210 {offsets = [0, 0], sizes = [2, 32], strides = [1, 1]} : vector<2x128xf32> to vector<2x32xf32>
    %c96_i32_75 = arith.constant 96 : i32
    %212 = tpu.dynamic_rotate %210 by %c96_i32_75 dim 1 : vector<2x128xf32>, i32 -> vector<2x128xf32>
    %213 = vector.extract_strided_slice %212 {offsets = [0, 0], sizes = [2, 32], strides = [1, 1]} : vector<2x128xf32> to vector<2x32xf32>
    %c64_i32_76 = arith.constant 64 : i32
    %214 = tpu.dynamic_rotate %210 by %c64_i32_76 dim 1 : vector<2x128xf32>, i32 -> vector<2x128xf32>
    %215 = vector.extract_strided_slice %214 {offsets = [0, 0], sizes = [2, 32], strides = [1, 1]} : vector<2x128xf32> to vector<2x32xf32>
    %c32_i32_77 = arith.constant 32 : i32
    %216 = tpu.dynamic_rotate %210 by %c32_i32_77 dim 1 : vector<2x128xf32>, i32 -> vector<2x128xf32>
    %217 = vector.extract_strided_slice %216 {offsets = [0, 0], sizes = [2, 32], strides = [1, 1]} : vector<2x128xf32> to vector<2x32xf32>
    %218 = arith.mulf %213, %177 : vector<2x32xf32>
    %219 = arith.mulf %211, %215 : vector<2x32xf32>
    %220 = arith.addf %218, %219 : vector<2x32xf32>
    %221 = math.tanh %220 : vector<2x32xf32>
    %222 = arith.mulf %217, %221 : vector<2x32xf32>
    %223 = tpu.concatenate %222, %201 in 1 : vector<2x32xf32>, vector<2x32xf32> -> vector<2x64xf32>
    %cst_78 = arith.constant dense<0.000000e+00> : vector<2x128xf32>
    %224 = tpu.matmul %223, %20, %cst_78 {dimension_numbers = #tpu.dot_dimension_numbers<[1], [0], [0], [1], [0, 0, 1, 1], [], []>} : vector<2x64xf32>, vector<64x128xf32>, vector<2x128xf32> -> vector<2x128xf32>
    %225 = vector.broadcast %21 : vector<1x128xf32> to vector<2x128xf32>
    %226 = arith.addf %224, %225 : vector<2x128xf32>
    %227 = math.tanh %226 : vector<2x128xf32>
    %cst_79 = arith.constant 5.000000e-01 : f32
    %228 = vector.broadcast %cst_79 : f32 to vector<2x128xf32>
    %229 = arith.mulf %228, %227 : vector<2x128xf32>
    %cst_80 = arith.constant 5.000000e-01 : f32
    %230 = vector.broadcast %cst_80 : f32 to vector<2x128xf32>
    %231 = arith.addf %229, %230 : vector<2x128xf32>
    %232 = arith.select %18, %227, %231 : vector<2x128xi1>, vector<2x128xf32>
    %233 = vector.extract_strided_slice %232 {offsets = [0, 0], sizes = [2, 32], strides = [1, 1]} : vector<2x128xf32> to vector<2x32xf32>
    %c96_i32_81 = arith.constant 96 : i32
    %234 = tpu.dynamic_rotate %232 by %c96_i32_81 dim 1 : vector<2x128xf32>, i32 -> vector<2x128xf32>
    %235 = vector.extract_strided_slice %234 {offsets = [0, 0], sizes = [2, 32], strides = [1, 1]} : vector<2x128xf32> to vector<2x32xf32>
    %c64_i32_82 = arith.constant 64 : i32
    %236 = tpu.dynamic_rotate %232 by %c64_i32_82 dim 1 : vector<2x128xf32>, i32 -> vector<2x128xf32>
    %237 = vector.extract_strided_slice %236 {offsets = [0, 0], sizes = [2, 32], strides = [1, 1]} : vector<2x128xf32> to vector<2x32xf32>
    %c32_i32_83 = arith.constant 32 : i32
    %238 = tpu.dynamic_rotate %232 by %c32_i32_83 dim 1 : vector<2x128xf32>, i32 -> vector<2x128xf32>
    %239 = vector.extract_strided_slice %238 {offsets = [0, 0], sizes = [2, 32], strides = [1, 1]} : vector<2x128xf32> to vector<2x32xf32>
    %240 = arith.mulf %235, %199 : vector<2x32xf32>
    %241 = arith.mulf %233, %237 : vector<2x32xf32>
    %242 = arith.addf %240, %241 : vector<2x32xf32>
    %243 = math.tanh %242 : vector<2x32xf32>
    %244 = arith.mulf %239, %243 : vector<2x32xf32>
    %245 = vector.extract_strided_slice %12 {offsets = [10, 0], sizes = [2, 128], strides = [1, 1]} : vector<16x128xf32> to vector<2x128xf32>
    %cst_84 = arith.constant dense<0.000000e+00> : vector<2x128xf32>
    %246 = tpu.matmul %222, %19, %cst_84 {dimension_numbers = #tpu.dot_dimension_numbers<[1], [0], [0], [1], [0, 0, 1, 1], [], []>} : vector<2x32xf32>, vector<32x128xf32>, vector<2x128xf32> -> vector<2x128xf32>
    %247 = arith.addf %245, %246 : vector<2x128xf32>
    %248 = math.tanh %247 : vector<2x128xf32>
    %cst_85 = arith.constant 5.000000e-01 : f32
    %249 = vector.broadcast %cst_85 : f32 to vector<2x128xf32>
    %250 = arith.mulf %249, %248 : vector<2x128xf32>
    %cst_86 = arith.constant 5.000000e-01 : f32
    %251 = vector.broadcast %cst_86 : f32 to vector<2x128xf32>
    %252 = arith.addf %250, %251 : vector<2x128xf32>
    %253 = arith.select %18, %248, %252 : vector<2x128xi1>, vector<2x128xf32>
    %254 = vector.extract_strided_slice %253 {offsets = [0, 0], sizes = [2, 32], strides = [1, 1]} : vector<2x128xf32> to vector<2x32xf32>
    %c96_i32_87 = arith.constant 96 : i32
    %255 = tpu.dynamic_rotate %253 by %c96_i32_87 dim 1 : vector<2x128xf32>, i32 -> vector<2x128xf32>
    %256 = vector.extract_strided_slice %255 {offsets = [0, 0], sizes = [2, 32], strides = [1, 1]} : vector<2x128xf32> to vector<2x32xf32>
    %c64_i32_88 = arith.constant 64 : i32
    %257 = tpu.dynamic_rotate %253 by %c64_i32_88 dim 1 : vector<2x128xf32>, i32 -> vector<2x128xf32>
    %258 = vector.extract_strided_slice %257 {offsets = [0, 0], sizes = [2, 32], strides = [1, 1]} : vector<2x128xf32> to vector<2x32xf32>
    %c32_i32_89 = arith.constant 32 : i32
    %259 = tpu.dynamic_rotate %253 by %c32_i32_89 dim 1 : vector<2x128xf32>, i32 -> vector<2x128xf32>
    %260 = vector.extract_strided_slice %259 {offsets = [0, 0], sizes = [2, 32], strides = [1, 1]} : vector<2x128xf32> to vector<2x32xf32>
    %261 = arith.mulf %256, %220 : vector<2x32xf32>
    %262 = arith.mulf %254, %258 : vector<2x32xf32>
    %263 = arith.addf %261, %262 : vector<2x32xf32>
    %264 = math.tanh %263 : vector<2x32xf32>
    %265 = arith.mulf %260, %264 : vector<2x32xf32>
    %266 = tpu.concatenate %265, %244 in 1 : vector<2x32xf32>, vector<2x32xf32> -> vector<2x64xf32>
    %cst_90 = arith.constant dense<0.000000e+00> : vector<2x128xf32>
    %267 = tpu.matmul %266, %20, %cst_90 {dimension_numbers = #tpu.dot_dimension_numbers<[1], [0], [0], [1], [0, 0, 1, 1], [], []>} : vector<2x64xf32>, vector<64x128xf32>, vector<2x128xf32> -> vector<2x128xf32>
    %268 = vector.broadcast %21 : vector<1x128xf32> to vector<2x128xf32>
    %269 = arith.addf %267, %268 : vector<2x128xf32>
    %270 = math.tanh %269 : vector<2x128xf32>
    %cst_91 = arith.constant 5.000000e-01 : f32
    %271 = vector.broadcast %cst_91 : f32 to vector<2x128xf32>
    %272 = arith.mulf %271, %270 : vector<2x128xf32>
    %cst_92 = arith.constant 5.000000e-01 : f32
    %273 = vector.broadcast %cst_92 : f32 to vector<2x128xf32>
    %274 = arith.addf %272, %273 : vector<2x128xf32>
    %275 = arith.select %18, %270, %274 : vector<2x128xi1>, vector<2x128xf32>
    %276 = vector.extract_strided_slice %275 {offsets = [0, 0], sizes = [2, 32], strides = [1, 1]} : vector<2x128xf32> to vector<2x32xf32>
    %c96_i32_93 = arith.constant 96 : i32
    %277 = tpu.dynamic_rotate %275 by %c96_i32_93 dim 1 : vector<2x128xf32>, i32 -> vector<2x128xf32>
    %278 = vector.extract_strided_slice %277 {offsets = [0, 0], sizes = [2, 32], strides = [1, 1]} : vector<2x128xf32> to vector<2x32xf32>
    %c64_i32_94 = arith.constant 64 : i32
    %279 = tpu.dynamic_rotate %275 by %c64_i32_94 dim 1 : vector<2x128xf32>, i32 -> vector<2x128xf32>
    %280 = vector.extract_strided_slice %279 {offsets = [0, 0], sizes = [2, 32], strides = [1, 1]} : vector<2x128xf32> to vector<2x32xf32>
    %c32_i32_95 = arith.constant 32 : i32
    %281 = tpu.dynamic_rotate %275 by %c32_i32_95 dim 1 : vector<2x128xf32>, i32 -> vector<2x128xf32>
    %282 = vector.extract_strided_slice %281 {offsets = [0, 0], sizes = [2, 32], strides = [1, 1]} : vector<2x128xf32> to vector<2x32xf32>
    %283 = arith.mulf %278, %242 : vector<2x32xf32>
    %284 = arith.mulf %276, %280 : vector<2x32xf32>
    %285 = arith.addf %283, %284 : vector<2x32xf32>
    %286 = math.tanh %285 : vector<2x32xf32>
    %287 = arith.mulf %282, %286 : vector<2x32xf32>
    %288 = vector.extract_strided_slice %12 {offsets = [12, 0], sizes = [2, 128], strides = [1, 1]} : vector<16x128xf32> to vector<2x128xf32>
    %cst_96 = arith.constant dense<0.000000e+00> : vector<2x128xf32>
    %289 = tpu.matmul %265, %19, %cst_96 {dimension_numbers = #tpu.dot_dimension_numbers<[1], [0], [0], [1], [0, 0, 1, 1], [], []>} : vector<2x32xf32>, vector<32x128xf32>, vector<2x128xf32> -> vector<2x128xf32>
    %290 = arith.addf %288, %289 : vector<2x128xf32>
    %291 = math.tanh %290 : vector<2x128xf32>
    %cst_97 = arith.constant 5.000000e-01 : f32
    %292 = vector.broadcast %cst_97 : f32 to vector<2x128xf32>
    %293 = arith.mulf %292, %291 : vector<2x128xf32>
    %cst_98 = arith.constant 5.000000e-01 : f32
    %294 = vector.broadcast %cst_98 : f32 to vector<2x128xf32>
    %295 = arith.addf %293, %294 : vector<2x128xf32>
    %296 = arith.select %18, %291, %295 : vector<2x128xi1>, vector<2x128xf32>
    %297 = vector.extract_strided_slice %296 {offsets = [0, 0], sizes = [2, 32], strides = [1, 1]} : vector<2x128xf32> to vector<2x32xf32>
    %c96_i32_99 = arith.constant 96 : i32
    %298 = tpu.dynamic_rotate %296 by %c96_i32_99 dim 1 : vector<2x128xf32>, i32 -> vector<2x128xf32>
    %299 = vector.extract_strided_slice %298 {offsets = [0, 0], sizes = [2, 32], strides = [1, 1]} : vector<2x128xf32> to vector<2x32xf32>
    %c64_i32_100 = arith.constant 64 : i32
    %300 = tpu.dynamic_rotate %296 by %c64_i32_100 dim 1 : vector<2x128xf32>, i32 -> vector<2x128xf32>
    %301 = vector.extract_strided_slice %300 {offsets = [0, 0], sizes = [2, 32], strides = [1, 1]} : vector<2x128xf32> to vector<2x32xf32>
    %c32_i32_101 = arith.constant 32 : i32
    %302 = tpu.dynamic_rotate %296 by %c32_i32_101 dim 1 : vector<2x128xf32>, i32 -> vector<2x128xf32>
    %303 = vector.extract_strided_slice %302 {offsets = [0, 0], sizes = [2, 32], strides = [1, 1]} : vector<2x128xf32> to vector<2x32xf32>
    %304 = arith.mulf %299, %263 : vector<2x32xf32>
    %305 = arith.mulf %297, %301 : vector<2x32xf32>
    %306 = arith.addf %304, %305 : vector<2x32xf32>
    %307 = math.tanh %306 : vector<2x32xf32>
    %308 = arith.mulf %303, %307 : vector<2x32xf32>
    %309 = tpu.concatenate %308, %287 in 1 : vector<2x32xf32>, vector<2x32xf32> -> vector<2x64xf32>
    %cst_102 = arith.constant dense<0.000000e+00> : vector<2x128xf32>
    %310 = tpu.matmul %309, %20, %cst_102 {dimension_numbers = #tpu.dot_dimension_numbers<[1], [0], [0], [1], [0, 0, 1, 1], [], []>} : vector<2x64xf32>, vector<64x128xf32>, vector<2x128xf32> -> vector<2x128xf32>
    %311 = vector.broadcast %21 : vector<1x128xf32> to vector<2x128xf32>
    %312 = arith.addf %310, %311 : vector<2x128xf32>
    %313 = math.tanh %312 : vector<2x128xf32>
    %cst_103 = arith.constant 5.000000e-01 : f32
    %314 = vector.broadcast %cst_103 : f32 to vector<2x128xf32>
    %315 = arith.mulf %314, %313 : vector<2x128xf32>
    %cst_104 = arith.constant 5.000000e-01 : f32
    %316 = vector.broadcast %cst_104 : f32 to vector<2x128xf32>
    %317 = arith.addf %315, %316 : vector<2x128xf32>
    %318 = arith.select %18, %313, %317 : vector<2x128xi1>, vector<2x128xf32>
    %319 = vector.extract_strided_slice %318 {offsets = [0, 0], sizes = [2, 32], strides = [1, 1]} : vector<2x128xf32> to vector<2x32xf32>
    %c96_i32_105 = arith.constant 96 : i32
    %320 = tpu.dynamic_rotate %318 by %c96_i32_105 dim 1 : vector<2x128xf32>, i32 -> vector<2x128xf32>
    %321 = vector.extract_strided_slice %320 {offsets = [0, 0], sizes = [2, 32], strides = [1, 1]} : vector<2x128xf32> to vector<2x32xf32>
    %c64_i32_106 = arith.constant 64 : i32
    %322 = tpu.dynamic_rotate %318 by %c64_i32_106 dim 1 : vector<2x128xf32>, i32 -> vector<2x128xf32>
    %323 = vector.extract_strided_slice %322 {offsets = [0, 0], sizes = [2, 32], strides = [1, 1]} : vector<2x128xf32> to vector<2x32xf32>
    %c32_i32_107 = arith.constant 32 : i32
    %324 = tpu.dynamic_rotate %318 by %c32_i32_107 dim 1 : vector<2x128xf32>, i32 -> vector<2x128xf32>
    %325 = vector.extract_strided_slice %324 {offsets = [0, 0], sizes = [2, 32], strides = [1, 1]} : vector<2x128xf32> to vector<2x32xf32>
    %326 = arith.mulf %321, %285 : vector<2x32xf32>
    %327 = arith.mulf %319, %323 : vector<2x32xf32>
    %328 = arith.addf %326, %327 : vector<2x32xf32>
    %329 = math.tanh %328 : vector<2x32xf32>
    %330 = arith.mulf %325, %329 : vector<2x32xf32>
    %331 = vector.extract_strided_slice %12 {offsets = [14, 0], sizes = [2, 128], strides = [1, 1]} : vector<16x128xf32> to vector<2x128xf32>
    %cst_108 = arith.constant dense<0.000000e+00> : vector<2x128xf32>
    %332 = tpu.matmul %308, %19, %cst_108 {dimension_numbers = #tpu.dot_dimension_numbers<[1], [0], [0], [1], [0, 0, 1, 1], [], []>} : vector<2x32xf32>, vector<32x128xf32>, vector<2x128xf32> -> vector<2x128xf32>
    %333 = arith.addf %331, %332 : vector<2x128xf32>
    %334 = math.tanh %333 : vector<2x128xf32>
    %cst_109 = arith.constant 5.000000e-01 : f32
    %335 = vector.broadcast %cst_109 : f32 to vector<2x128xf32>
    %336 = arith.mulf %335, %334 : vector<2x128xf32>
    %cst_110 = arith.constant 5.000000e-01 : f32
    %337 = vector.broadcast %cst_110 : f32 to vector<2x128xf32>
    %338 = arith.addf %336, %337 : vector<2x128xf32>
    %339 = arith.select %18, %334, %338 : vector<2x128xi1>, vector<2x128xf32>
    %340 = vector.extract_strided_slice %339 {offsets = [0, 0], sizes = [2, 32], strides = [1, 1]} : vector<2x128xf32> to vector<2x32xf32>
    %c96_i32_111 = arith.constant 96 : i32
    %341 = tpu.dynamic_rotate %339 by %c96_i32_111 dim 1 : vector<2x128xf32>, i32 -> vector<2x128xf32>
    %342 = vector.extract_strided_slice %341 {offsets = [0, 0], sizes = [2, 32], strides = [1, 1]} : vector<2x128xf32> to vector<2x32xf32>
    %c64_i32_112 = arith.constant 64 : i32
    %343 = tpu.dynamic_rotate %339 by %c64_i32_112 dim 1 : vector<2x128xf32>, i32 -> vector<2x128xf32>
    %344 = vector.extract_strided_slice %343 {offsets = [0, 0], sizes = [2, 32], strides = [1, 1]} : vector<2x128xf32> to vector<2x32xf32>
    %c32_i32_113 = arith.constant 32 : i32
    %345 = tpu.dynamic_rotate %339 by %c32_i32_113 dim 1 : vector<2x128xf32>, i32 -> vector<2x128xf32>
    %346 = vector.extract_strided_slice %345 {offsets = [0, 0], sizes = [2, 32], strides = [1, 1]} : vector<2x128xf32> to vector<2x32xf32>
    %347 = arith.mulf %342, %306 : vector<2x32xf32>
    %348 = arith.mulf %340, %344 : vector<2x32xf32>
    %349 = arith.addf %347, %348 : vector<2x32xf32>
    %350 = math.tanh %349 : vector<2x32xf32>
    %351 = arith.mulf %346, %350 : vector<2x32xf32>
    %352 = tpu.concatenate %351, %330 in 1 : vector<2x32xf32>, vector<2x32xf32> -> vector<2x64xf32>
    %cst_114 = arith.constant dense<0.000000e+00> : vector<2x128xf32>
    %353 = tpu.matmul %352, %20, %cst_114 {dimension_numbers = #tpu.dot_dimension_numbers<[1], [0], [0], [1], [0, 0, 1, 1], [], []>} : vector<2x64xf32>, vector<64x128xf32>, vector<2x128xf32> -> vector<2x128xf32>
    %354 = vector.broadcast %21 : vector<1x128xf32> to vector<2x128xf32>
    %355 = arith.addf %353, %354 : vector<2x128xf32>
    %356 = math.tanh %355 : vector<2x128xf32>
    %cst_115 = arith.constant 5.000000e-01 : f32
    %357 = vector.broadcast %cst_115 : f32 to vector<2x128xf32>
    %358 = arith.mulf %357, %356 : vector<2x128xf32>
    %cst_116 = arith.constant 5.000000e-01 : f32
    %359 = vector.broadcast %cst_116 : f32 to vector<2x128xf32>
    %360 = arith.addf %358, %359 : vector<2x128xf32>
    %361 = arith.select %18, %356, %360 : vector<2x128xi1>, vector<2x128xf32>
    %362 = vector.extract_strided_slice %361 {offsets = [0, 0], sizes = [2, 32], strides = [1, 1]} : vector<2x128xf32> to vector<2x32xf32>
    %c96_i32_117 = arith.constant 96 : i32
    %363 = tpu.dynamic_rotate %361 by %c96_i32_117 dim 1 : vector<2x128xf32>, i32 -> vector<2x128xf32>
    %364 = vector.extract_strided_slice %363 {offsets = [0, 0], sizes = [2, 32], strides = [1, 1]} : vector<2x128xf32> to vector<2x32xf32>
    %c64_i32_118 = arith.constant 64 : i32
    %365 = tpu.dynamic_rotate %361 by %c64_i32_118 dim 1 : vector<2x128xf32>, i32 -> vector<2x128xf32>
    %366 = vector.extract_strided_slice %365 {offsets = [0, 0], sizes = [2, 32], strides = [1, 1]} : vector<2x128xf32> to vector<2x32xf32>
    %c32_i32_119 = arith.constant 32 : i32
    %367 = tpu.dynamic_rotate %361 by %c32_i32_119 dim 1 : vector<2x128xf32>, i32 -> vector<2x128xf32>
    %368 = vector.extract_strided_slice %367 {offsets = [0, 0], sizes = [2, 32], strides = [1, 1]} : vector<2x128xf32> to vector<2x32xf32>
    %369 = arith.mulf %364, %328 : vector<2x32xf32>
    %370 = arith.mulf %362, %366 : vector<2x32xf32>
    %371 = arith.addf %369, %370 : vector<2x32xf32>
    %372 = math.tanh %371 : vector<2x32xf32>
    %373 = arith.mulf %368, %372 : vector<2x32xf32>
    %374 = tpu.concatenate %351, %349, %373, %371 in 1 : vector<2x32xf32>, vector<2x32xf32>, vector<2x32xf32>, vector<2x32xf32> -> vector<2x128xf32>
    %c0_120 = arith.constant 0 : index
    %c0_121 = arith.constant 0 : index
    %375 = vector.load %arg11[%c0_120, %c0_121] : memref<2x128xf32, #tpu.memory_space<vmem>>, vector<2x128xf32>
    tpu.vector_store %arg11[%c0_120, %c0_121], %374 {strides = array<i32>} : memref<2x128xf32, #tpu.memory_space<vmem>>, vector<2x128xf32>,
    %c0_122 = arith.constant 0 : index
    %c0_123 = arith.constant 0 : index
    %376 = vector.load %arg9[%c0_122, %c0_123] : memref<1x32xf32, #tpu.memory_space<vmem>>, vector<1x32xf32>
    %377 = vector.broadcast %376 : vector<1x32xf32> to vector<2x32xf32>
    %378 = arith.mulf %373, %377 : vector<2x32xf32>
    %cst_124 = arith.constant dense<0.000000e+00> : vector<2xf32>
    %379 = vector.multi_reduction <add>, %378, %cst_124 [1] : vector<2x32xf32> to vector<2xf32>
    %380 = vector.shape_cast %379 : vector<2xf32> to vector<2x1xf32>
    %c0_125 = arith.constant 0 : index
    %c0_126 = arith.constant 0 : index
    %381 = vector.load %arg10[%c0_125, %c0_126] : memref<1x1xf32, #tpu.memory_space<vmem>>, vector<1x1xf32>
    %382 = vector.broadcast %381 : vector<1x1xf32> to vector<2x1xf32>
    %383 = arith.addf %380, %382 : vector<2x1xf32>
    %384 = arith.negf %383 : vector<2x1xf32>
    %385 = math.exp %384 : vector<2x1xf32>
    %cst_127 = arith.constant 1.000000e+00 : f32
    %386 = vector.broadcast %cst_127 : f32 to vector<2x1xf32>
    %387 = arith.addf %386, %385 : vector<2x1xf32>
    %388 = arith.divf %386, %387 : vector<2x1xf32>
    %c0_128 = arith.constant 0 : index
    %c0_129 = arith.constant 0 : index
    %389 = vector.load %arg12[%c0_128, %c0_129] : memref<2x1xf32, #tpu.memory_space<vmem>>, vector<2x1xf32>
    tpu.vector_store %arg12[%c0_128, %c0_129], %388 {strides = array<i32>} : memref<2x1xf32, #tpu.memory_space<vmem>>, vector<2x1xf32>,
    return
  }
}

</mosaic_0001>

<bundles_post_ra>
// kernel: sentiment_forward.1
= control target key start
LH: loop header
LB: loop body
LE: loop exit
PB: predicated region body
PF: predicated region fallthrough
CT: control target
= control target key end

     0   :  { %s3076_s0 = inlined_call_operand.vmem [shape: s32[16,1], index: 0, kind: input, shape index: {}]   ;;  %s3077_s1 = inlined_call_operand.vmem [shape: f32[50,32], index: 1, kind: input, shape index: {}]   ;;  %s3078_s2 = inlined_call_operand.vmem [shape: f32[32,128], index: 2, kind: input, shape index: {}]   ;;  %s3079_s3 = inlined_call_operand.hbm [shape: f32[32,128], index: 3, kind: input, shape index: {}]   ;;  %s3080_s4 = inlined_call_operand.vmem [shape: f32[1,128], index: 4, kind: input, shape index: {}]   ;;  %s3081_s5 = inlined_call_operand.vmem [shape: f32[64,128], index: 5, kind: input, shape index: {}]   ;;  %s3082_s6 = inlined_call_operand.hbm [shape: f32[1,128], index: 6, kind: input, shape index: {}]   ;;  %s3083_s7 = inlined_call_operand.vmem [shape: f32[2,2,32], index: 7, kind: input, shape index: {}]   ;;  %s3084_s8 = inlined_call_operand.vmem [shape: f32[2,2,32], index: 8, kind: input, shape index: {}]   ;;  %s3085_s9 = inlined_call_operand.vmem [shape: f32[1,32], index: 9, kind: input, shape index: {}]   ;;  %s3086_s10 = inlined_call_operand.<no memory space> [shape: f32[1,1], index: 10, kind: input, shape index: {}]   ;;  %s3087_s11 = inlined_call_operand.vmem [shape: f32[2,128], index: 11, kind: output, shape index: {0}]   ;;  %s3088_s12 = inlined_call_operand.vmem [shape: f32[2,1], index: 12, kind: output, shape index: {1}]  }
   0x1   :  { %v18_v0 = vstv %s3086_s10 }
   0x2   :  { %19 = vst [vmem:[#allocation2] sm:$0x1] %v18_v0 }
   0x3   :  { %20 = vsyncpa [#allocation4], 0 }
   0x4   :  { %21 = vsyncpa [#allocation6], 0  ;;  %s2599_s23 = smov [#allocation3]   ;;  %s2551_s27 = scalar_lea.hbm %s3079_s3, 512 }
   0x5   :  { %s33_s24 = sshll.u32 %s2599_s23, 4  ;;  %p2552_p0 = scmp.ne.s32.totalorder %s3079_s3, %s2551_s27  ;;  %s34_s24 = int_to_ptr.vmem [resolvable:$true] %s33_s24 }
   0x6   :  { %p2555_p1 = scmp.lt.u32.totalorder %s2551_s27, %s3079_s3 }
   0x8   :  { %p2557_p2 = pnand %p2555_p1, %p2552_p0 }
   0xa   :  { %2560 = shalt.err (!%p2557_p2)
}
   0xb   :  { %s2561_s10 = scalar_lea.vmem %s34_s24, 512  ;;  %p2566_p4 = scmp.lt.s32.totalorder %s34_s24, %s34_s24 }
   0xc   :  { %p2562_p3 = scmp.ne.s32.totalorder %s34_s24, %s2561_s10  ;;  %p2567_p5 = scmp.lt.s32.totalorder %s2561_s10, %s2561_s10 }
   0xe   :  { %p2568_p6 = por %p2567_p5, %p2566_p4 }
  0x10   :  { %p2569_p7 = pnand %p2568_p6, %p2562_p3 }
  0x12   :  { %2572 = shalt.err (!%p2569_p7)
}
  0x13   :  { %s2600_s14 = smov 128   ;;  %s2601_s15 = smov 8  }
  0x14   :  { %39 = dma.hbm_to_vmem [thread:$0]  %s3079_s3, 512, %s34_s24, [#allocation4], %s2600_s14, %s2600_s14, %s2601_s15  }
  0x15   :  { %s2602_s18 = smov [#allocation5]   ;;  %s2573_s22 = scalar_lea.hbm %s3082_s6, 16 }
  0x16   :  { %s50_s19 = sshll.u32 %s2602_s18, 4  ;;  %p2574_p8 = scmp.ne.s32.totalorder %s3082_s6, %s2573_s22  ;;  %s51_s19 = int_to_ptr.vmem [resolvable:$true] %s50_s19 }
  0x17   :  { %p2577_p9 = scmp.lt.u32.totalorder %s2573_s22, %s3082_s6 }
  0x19   :  { %p2579_p10 = pnand %p2577_p9, %p2574_p8 }
  0x1b   :  { %2582 = shalt.err (!%p2579_p10)
}
  0x1c   :  { %s2583_s28 = scalar_lea.vmem %s51_s19, 16  ;;  %s2587_s3 = scalar_lea.vmem %s51_s19, 32 }
  0x1d   :  { %p2584_p11 = scmp.ne.s32.totalorder %s51_s19, %s2583_s28  ;;  %p2588_p12 = scmp.lt.s32.totalorder %s51_s19, %s51_s19 }
  0x1e   :  { %p2589_p13 = scmp.lt.s32.totalorder %s2587_s3, %s2583_s28 }
  0x20   :  { %p2590_p0 = por %p2589_p13, %p2588_p12 }
  0x22   :  { %p2591_p1 = pnand %p2590_p0, %p2584_p11 }
  0x24   :  { %2594 = shalt.err (!%p2591_p1)
}
  0x25   :  { %53 = dma.hbm_to_vmem [thread:$0]  %s3082_s6, 16, %s51_s19, [#allocation6]  }
  0x26   :  { %2595 = dma.done.wait [#allocation4], 512  }
  0x27   :  { %2596 = vsyncadd [#allocation4], 4294966784 }
  0x28   :  { %2597 = dma.done.wait [#allocation6], 16  }
  0x29   :  { %2598 = vsyncadd [#allocation6], 4294967280  ;;  %v2603_v1 = vmov 0   ;;  %v68_v2 = vld [vmem:[%s3076_s0] sm:$0xff]  ;;  %v85_v4 = vld [vmem:[%s3077_s1 + $0x8] sm:$0xff]  ;;  %v2604_v15 = vmov 0.0|0.0   ;;  %v70_v21 = vlaneseq }
  0x2a   :  { %2482 = vset.pattern.permute.xlu0 %v2603_v1  ;;  %v84_v3 = vld [vmem:[%s3077_s1] sm:$0xff]  ;;  %v86_v5 = vld [vmem:[%s3077_s1 + $0x10] sm:$0xff]  ;;  %v87_v6 = vld [vmem:[%s3077_s1 + $0x18] sm:$0xff]  ;;  %2327 = vmatprep.subr.bf16.mxu1 %v2604_v15  ;;  %vm98_vm0 = vcmask 1041408   ;;  %vm91_vm1 = vcmask 408576   ;;  %v2605_v24 = vmov 0.0  }
  0x2b   :  { %73 = vperm.xlu0 %2482, %v68_v2   ;;  %v69_v7 = vld [vmem:[%s3076_s0 + $0x8] sm:$0xff]  ;;  %v2307_v8 = vpack.c.bf16 %v85_v4, %v84_v3  ;;  %v2311_v9 = vpack.c.bf16 %v87_v6, %v86_v5  ;;  %v88_v10 = vld [vmem:[%s3077_s1 + $0x20] sm:$0xff]  ;;  %v90_v17 = vld [vmem:[%s3077_s1 + $0x30] sm:$0x3]  ;;  %v71_v22 = vand.u32 127, %v70_v21  ;;  %vm188_vm4 = vcmask 261120  }
  0x2c   :  { %v89_v11 = vld [vmem:[%s3077_s1 + $0x28] sm:$0xff]  ;;  %v177_v18 = vld [vmem:[%s3078_s2] sm:$0xff]  ;;  %v179_v26 = vld [vmem:[%s3078_s2 + $0x10] sm:$0xff]  ;;  %vm2606_vm5 = vmmov 0   ;;  %s2607_s29 = smov 32   ;;  %s2608_s1 = smov 96  }
  0x2d   :  { %2308 = vmatprep.subr.bf16.mxu0 %v2307_v8  ;;  %v2315_v12 = vpack.c.bf16 %v89_v11, %v88_v10  ;;  %v273_v13 = vld [vmem:[#allocation3] sm:$0xff]  ;;  %v274_v14 = vld [vmem:[#allocation3 + $0x8] sm:$0xff]  ;;  %v180_v27 = vld [vmem:[%s3078_s2 + $0x18] sm:$0xff]  ;;  %2075 = vmatprep.mubr.msk.f32.mxu1 %vm2606_vm5, %v2605_v24  ;;  %vm270_vm6 = vcmp.ge.s32.totalorder %v71_v22, 64  ;;  %vm271_vm7 = vcmp.lt.s32.totalorder %v71_v22, 96  ;;  %s2609_s30 = smov 64  }
  0x2e   :  { %2310 = vmatpush3.bf16.msra.mxu0 %v2307_v8  ;;  %v2727_v16 = vpack.c.bf16 %v274_v14, %v273_v13  ;;  %v178_v19 = vld [vmem:[%s3078_s2 + $0x8] sm:$0xff]  ;;  %v2323_v29 = vpack.c.bf16 %v180_v27, %v179_v26  ;;  %v275_v31 = vld [vmem:[#allocation3 + $0x10] sm:$0xff]  ;;  %v276_v32 = vld [vmem:[#allocation3 + $0x18] sm:$0xff]  ;;  %vm392_vm9 = vcmask 523264   ;;  %vm1852_vm10 = vcmask 254976  }
  0x2f   :  { %76 = vperm.xlu0 %2482, %v69_v7   ;;  %2312 = vmatprep.subr.bf16.mxu0 %v2311_v9  ;;  %v2319_v20 = vpack.c.bf16 %v178_v19, %v177_v18  ;;  %v2749_v33 = vpack.c.bf16 %v276_v32, %v275_v31  ;;  %v286_v34 = vld [vmem:[%s3083_s7] sm:$0x3]  ;;  %v278_v46 = vld [vmem:[%s3081_s5 + $0x8] sm:$0xff]  ;;  %v279_v50 = vld [vmem:[%s3081_s5 + $0x10] sm:$0xff]  ;;  %vm1841_vm11 = vcmask 785408   ;;  %vm1870_vm12 = vcmask 1024  }
  0x30   :  { %2329 = vmatpush3.bf16.msra.mxu1 %v2727_v16  ;;  %v1887_v39 = vld [vmem:[%s3080_s4] ss:$0 sm:$0xff]  ;;  %v280_v51 = vld [vmem:[%s3081_s5 + $0x18] sm:$0xff]  ;;  %vm2796_vm8 = vmand %vm270_vm6, %vm271_vm7 }
  0x31   :  { %2330 = vmatprep.subr.bf16.mxu1 %v2604_v15  ;;  %v277_v45 = vld [vmem:[%s3081_s5] sm:$0xff]  ;;  %v2800_v54 = vpack.c.bf16 %v280_v51, %v279_v50  ;;  %v282_v55 = vld [vmem:[%s3081_s5 + $0x28] sm:$0xff]  ;;  %v283_v59 = vld [vmem:[%s3081_s5 + $0x30] sm:$0xff] }
  0x32   :  { %2314 = vmatpush3.bf16.msra.mxu0 %v2311_v9  ;;  %v2783_v47 = vpack.c.bf16 %v278_v46, %v277_v45  ;;  %v281_v52 = vld [vmem:[%s3081_s5 + $0x20] sm:$0xff]  ;;  %v284_v60 = vld [vmem:[%s3081_s5 + $0x38] sm:$0xff] }
  0x33   :  { %2316 = vmatprep.subr.bf16.mxu0 %v2315_v12  ;;  %v2806_v57 = vpack.c.bf16 %v282_v55, %v281_v52  ;;  %v2820_v61 = vpack.c.bf16 %v284_v60, %v283_v59  ;;  %v1890_v62 = vld [vmem:[%s3083_s7 + $0x2] sm:$0x3]  ;;  %v287_v0 = vld [vmem:[%s3084_s8] sm:$0x3] }
  0x34   :  { %2332 = vmatpush3.bf16.msra.mxu1 %v2749_v33  ;;  %v2852_v10 = vld [vmem:[#allocation5] ss:$0 sm:$0xff]  ;;  %v1909_v53 = vld [vmem:[%s3085_s9] ss:$0 sm:$0xff] }
  0x35   :  { %2345 = vmatprep.subr.bf16.mxu1 %v2604_v15 }
  0x36   :  { %2318 = vmatpush3.bf16.msra.mxu0 %v2315_v12 }
  0x37   :  { %2051 = vmatprep.subr.msk.mxu0 %vm98_vm0, %v90_v17  ;;  %2076 = vmatmul.mubr.msk.f32.vlgmr.msra.gmra.mrb[0].mxu1 %vm188_vm4, %v286_v34 }
  0x38   :  { %2347 = vmatpush3.bf16.msra.mxu1 %v2727_v16  ;;  %2105 = vmatprep.mubr.msk.f32.mxu1 %vm2606_vm5, %v2605_v24 }
  0x39   :  { %2348 = vmatprep.subr.bf16.mxu1 %v2604_v15 }
  0x3a   :  { %2052 = vmatpush3.msk.msra.mxu0 %vm98_vm0, %v90_v17 }
  0x3b   :  { %2320 = vmatprep.subr.bf16.mxu0 %v2319_v20 }
  0x3c   :  { %2350 = vmatpush3.bf16.msra.mxu1 %v2749_v33 }
  0x3d   :  { %2351 = vmatprep.subr.bf16.mxu1 %v2604_v15 }
  0xaa   :  { %v74_v23 = vpop.permute.xlu0 %73 }
  0xab   :  { %vm78_vm2 = vcmp.eq.s32.totalorder %v74_v23, %v71_v22 }
  0xac   :  { %v1882_v25 = vsel %vm78_vm2, 1.0, %v2605_v24 }
  0xad   :  { %2053 = vmatprep.mubr.msk.f32.mxu0 %vm91_vm1, %v1882_v25 }
  0xae   :  { %v77_v28 = vpop.permute.xlu0 %76 }
  0xaf   :  { %vm79_vm3 = vcmp.eq.s32.totalorder %v77_v28, %v71_v22 }
  0xb0   :  { %v1883_v30 = vsel %vm79_vm3, 1.0, %v2605_v24 }
  0xb1   :  { %2054 = vmatmul.mubr.msk.f32.vlgmr.msra.gmra.mrb[0].mxu0 %vm91_vm1, %v1883_v30  ;;  %v1891_v30 = vld [vmem:[%s3084_s8 + $0x2] sm:$0x3] }
  0xb2   :  { %2322 = vmatpush3.bf16.msra.mxu0 %v2319_v20 }
  0xb3   :  { %2324 = vmatprep.subr.bf16.mxu0 %v2323_v29 }
  0xb6   :  { %2326 = vmatpush3.bf16.msra.mxu0 %v2323_v29 }
  0xb7   :  { %2333 = vmatprep.subr.bf16.mxu0 %v2604_v15 }
 0x10a   :  { %v361_v37 = vpop.f32.mrb[0].mxu1 }
 0x10b   :  { %v2077_v38 = vpop.f32.mrb[1].mxu1 }
 0x184   :  { %v2055_v35 = vpop.f32.mrb[0].mxu0 }
 0x185   :  { %v168_v36 = vpop.f32.mrb[1].mxu0 }
 0x186   :  { %2064 = vmatprep.mubr.msk.f32.mxu0 %vm188_vm4, %v168_v36 }
 0x187   :  { %2065 = vmatmul.mubr.msk.f32.vlgmr.msra.gmra.mrb[2].mxu0 %vm188_vm4, %v2055_v35 }
 0x188   :  { %2094 = vmatprep.mubr.msk.f32.mxu0 %vm2606_vm5, %v2605_v24  ;;  %2335 = vmatpush3.bf16.msra.mxu0 %v2783_v47 }
 0x189   :  { %2336 = vmatprep.subr.bf16.mxu0 %v2604_v15 }
 0x18c   :  { %2338 = vmatpush3.bf16.msra.mxu0 %v2800_v54 }
 0x18d   :  { %2339 = vmatprep.subr.bf16.mxu0 %v2604_v15 }
 0x190   :  { %2341 = vmatpush3.bf16.msra.mxu0 %v2806_v57 }
 0x191   :  { %2342 = vmatprep.subr.bf16.mxu0 %v2604_v15 }
 0x194   :  { %2344 = vmatpush3.bf16.msra.mxu0 %v2820_v61 }
 0x195   :  { %2363 = vmatprep.subr.bf16.mxu0 %v2604_v15 }
 0x25a   :  { %v2066_v40 = vpop.f32.mrb[2].mxu0 }
 0x25b   :  { %v2772_v41 = vadd.f32 %v2066_v40, %v1887_v39  ;;  %v261_v42 = vpop.f32.mrb[3].mxu0 }
 0x25c   :  { %v2774_v43 = vadd.f32 %v1887_v39, %v261_v42 }
 0x25e   :  { %v365_v44 = vadd.f32 %v361_v37, %v2774_v43 }
 0x260   :  { %2483 = vtanh.f32 %v365_v44 }
 0x26a   :  { %v2484_v48 = vpop.eup %2483 }
 0x26b   :  { %v367_v49 = vmul.f32 0.5, %v2484_v48 }
 0x26d   :  { %v368_v56 = vadd.f32 0.5, %v367_v49 }
 0x26f   :  { %v369_v58 = vsel %vm2796_vm8, %v2484_v48, %v368_v56 }
 0x270   :  { %374 = vrot.lane.b32.xlu0 %v369_v58, %s2607_s29  ;;  %370 = vrot.lane.b32.xlu1 %v369_v58, %s2608_s1 }
 0x274   :  { %372 = vrot.lane.b32.xlu1 %v369_v58, %s2609_s30 }
 0x278   :  { %382 = vrot.lane.b32.xlu1 %v1890_v62, %s2607_s29 }
 0x2e2   :  { %v371_v63 = vpop.permute.xlu1 %370  ;;  %v375_v6 = vpop.permute.xlu0 %374 }
 0x2e3   :  { %v376_v2 = vmul.f32 %v371_v63, %v287_v0 }
 0x2e6   :  { %v373_v1 = vpop.permute.xlu1 %372 }
 0x2e7   :  { %v377_v3 = vmul.f32 %v373_v1, %v369_v58 }
 0x2e9   :  { %v378_v4 = vadd.f32 %v377_v3, %v376_v2 }
 0x2ea   :  { %v383_v7 = vpop.permute.xlu1 %382 }
 0x2eb   :  { %2485 = vtanh.f32 %v378_v4 }
 0x2f5   :  { %v2486_v5 = vpop.eup %2485 }
 0x2f6   :  { %v380_v8 = vmul.f32 %v2486_v5, %v375_v6 }
 0x2f8   :  { %v385_v9 = vsel %vm188_vm4, %v380_v8, %v383_v7  ;;  %2106 = vmatmul.mubr.msk.f32.vlgmr.msra.gmra.mrb[2].mxu1 %vm188_vm4, %v380_v8 }
 0x2f9   :  { %2095 = vmatmul.mubr.msk.f32.vlgmr.msra.gmra.mrb[4].mxu0 %vm392_vm9, %v385_v9  ;;  %2353 = vmatpush3.bf16.msra.mxu1 %v2783_v47 }
 0x2fa   :  { %2365 = vmatpush3.bf16.msra.mxu0 %v2727_v16  ;;  %2135 = vmatprep.mubr.msk.f32.mxu0 %vm2606_vm5, %v2605_v24 }
 0x2fb   :  { %2366 = vmatprep.subr.bf16.mxu0 %v2604_v15  ;;  %2354 = vmatprep.subr.bf16.mxu1 %v2604_v15 }
 0x2fc   :  { %2124 = vmatprep.mubr.msk.f32.mxu1 %vm2606_vm5, %v2605_v24 }
 0x2fd   :  { %2356 = vmatpush3.bf16.msra.mxu1 %v2800_v54 }
 0x2fe   :  { %2368 = vmatpush3.bf16.msra.mxu0 %v2749_v33  ;;  %2357 = vmatprep.subr.bf16.mxu1 %v2604_v15 }
 0x2ff   :  { %2369 = vmatprep.subr.bf16.mxu0 %v2604_v15 }
 0x301   :  { %2359 = vmatpush3.bf16.msra.mxu1 %v2806_v57 }
 0x302   :  { %2360 = vmatprep.subr.bf16.mxu1 %v2604_v15 }
 0x305   :  { %2362 = vmatpush3.bf16.msra.mxu1 %v2820_v61 }
 0x306   :  { %2381 = vmatprep.subr.bf16.mxu1 %v2604_v15 }
 0x3cb   :  { %v550_v11 = vpop.f32.mrb[2].mxu1 }
 0x3cc   :  { %v555_v12 = vrot.slane %v550_v11, 6  ;;  %v462_v13 = vpop.f32.mrb[4].mxu0  ;;  %v2107_v14 = vpop.f32.mrb[3].mxu1 }
 0x3cd   :  { %v463_v17 = vadd.f32 %v2852_v10, %v462_v13  ;;  %v2096_v18 = vpop.f32.mrb[5].mxu0 }
 0x3ce   :  { %v557_v19 = vadd.f32 %v555_v12, %v2774_v43 }
 0x3cf   :  { %2487 = vtanh.f32 %v463_v17 }
 0x3d0   :  { %2489 = vtanh.f32 %v557_v19 }
 0x3d9   :  { %v2488_v20 = vpop.eup %2487 }
 0x3da   :  { %v2490_v21 = vpop.eup %2489  ;;  %v467_v22 = vmul.f32 0.5, %v2488_v20 }
 0x3db   :  { %v559_v23 = vmul.f32 0.5, %v2490_v21 }
 0x3dc   :  { %v468_v25 = vadd.f32 0.5, %v467_v22 }
 0x3dd   :  { %v560_v26 = vadd.f32 0.5, %v559_v23 }
 0x3de   :  { %v469_v27 = vsel %vm2796_vm8, %v2488_v20, %v468_v25 }
 0x3df   :  { %472 = vrot.lane.b32.xlu1 %v469_v27, %s2609_s30  ;;  %470 = vrot.lane.b32.xlu0 %v469_v27, %s2608_s1  ;;  %v561_v28 = vsel %vm2796_vm8, %v2490_v21, %v560_v26 }
 0x3e0   :  { %v563_v29 = vrot.slane %v561_v28, 2 }
 0x3e3   :  { %567 = vrot.lane.b32.xlu1 %v563_v29, %s2609_s30  ;;  %474 = vrot.lane.b32.xlu0 %v469_v27, %s2607_s29 }
 0x3e7   :  { %569 = vrot.lane.b32.xlu1 %v563_v29, %s2607_s29  ;;  %565 = vrot.lane.b32.xlu0 %v563_v29, %s2608_s1 }
 0x451   :  { %v473_v31 = vpop.permute.xlu1 %472  ;;  %v471_v32 = vpop.permute.xlu0 %470 }
 0x452   :  { %v477_v34 = vmul.f32 %v473_v31, %v469_v27  ;;  %v476_v35 = vmul.f32 %v1891_v30, %v471_v32 }
 0x454   :  { %v478_v36 = vadd.f32 %v477_v34, %v476_v35 }
 0x455   :  { %v568_v37 = vpop.permute.xlu1 %567  ;;  %v475_v38 = vpop.permute.xlu0 %474 }
 0x456   :  { %2491 = vtanh.f32 %v478_v36  ;;  %v573_v39 = vrot.slane %v568_v37, 6 }
 0x458   :  { %v575_v40 = vmul.f32 %v573_v39, %v561_v28 }
 0x459   :  { %v566_v42 = vpop.permute.xlu0 %565  ;;  %v570_v51 = vpop.permute.xlu1 %569 }
 0x45a   :  { %v577_v44 = vrot.slane %v575_v40, 2  ;;  %v571_v45 = vmul.f32 %v566_v42, %v378_v4 }
 0x45c   :  { %v579_v46 = vadd.f32 %v577_v44, %v571_v45 }
 0x45e   :  { %2493 = vtanh.f32 %v579_v46 }
 0x460   :  { %v2492_v48 = vpop.eup %2491 }
 0x461   :  { %v480_v49 = vmul.f32 %v2492_v48, %v475_v38 }
 0x463   :  { %583 = vrot.lane.b32.xlu0 %v480_v49, %s2607_s29 }
 0x468   :  { %v2494_v50 = vpop.eup %2493 }
 0x469   :  { %v581_v52 = vmul.f32 %v2494_v50, %v570_v51 }
 0x46b   :  { %2136 = vmatmul.mubr.msk.f32.vlgmr.msra.gmra.mrb[6].mxu0 %vm188_vm4, %v581_v52 }
 0x46c   :  { %2371 = vmatpush3.bf16.msra.mxu0 %v2783_v47  ;;  %2154 = vmatprep.mubr.msk.f32.mxu0 %vm2606_vm5, %v2605_v24 }
 0x46d   :  { %2372 = vmatprep.subr.bf16.mxu0 %v2604_v15 }
 0x470   :  { %2374 = vmatpush3.bf16.msra.mxu0 %v2800_v54 }
 0x471   :  { %2375 = vmatprep.subr.bf16.mxu0 %v2604_v15 }
 0x474   :  { %2377 = vmatpush3.bf16.msra.mxu0 %v2806_v57 }
 0x475   :  { %2378 = vmatprep.subr.bf16.mxu0 %v2604_v15 }
 0x478   :  { %2380 = vmatpush3.bf16.msra.mxu0 %v2820_v61 }
 0x479   :  { %2399 = vmatprep.subr.bf16.mxu0 %v2604_v15 }
 0x4d5   :  { %v584_v55 = vpop.permute.xlu0 %583 }
 0x4d6   :  { %v586_v56 = vsel %vm188_vm4, %v581_v52, %v584_v55 }
 0x4d7   :  { %2125 = vmatmul.mubr.msk.f32.vlgmr.msra.gmra.mrb[4].mxu1 %vm392_vm9, %v586_v56 }
 0x4d8   :  { %2383 = vmatpush3.bf16.msra.mxu1 %v2727_v16  ;;  %2165 = vmatprep.mubr.msk.f32.mxu1 %vm2606_vm5, %v2605_v24 }
 0x4d9   :  { %2384 = vmatprep.subr.bf16.mxu1 %v2604_v15 }
 0x4dc   :  { %2386 = vmatpush3.bf16.msra.mxu1 %v2749_v33 }
 0x4dd   :  { %2387 = vmatprep.subr.bf16.mxu1 %v2604_v15 }
 0x53e   :  { %v744_v58 = vpop.f32.mrb[6].mxu0 }
 0x53f   :  { %v2137_v59 = vpop.f32.mrb[7].mxu0  ;;  %v749_v60 = vrot.slane %v744_v58, 4 }
 0x541   :  { %v751_v62 = vadd.f32 %v749_v60, %v2774_v43 }
 0x543   :  { %2495 = vtanh.f32 %v751_v62 }
 0x54d   :  { %v2496_v2 = vpop.eup %2495 }
 0x54e   :  { %v753_v3 = vmul.f32 0.5, %v2496_v2 }
 0x550   :  { %v754_v6 = vadd.f32 0.5, %v753_v3 }
 0x552   :  { %v755_v9 = vsel %vm2796_vm8, %v2496_v2, %v754_v6 }
 0x553   :  { %v757_v11 = vrot.slane %v755_v9, 4 }
 0x5aa   :  { %v656_v63 = vpop.f32.mrb[4].mxu1 }
 0x5ab   :  { %v657_v0 = vadd.f32 %v2852_v10, %v656_v63  ;;  %v2126_v1 = vpop.f32.mrb[5].mxu1 }
 0x5ad   :  { %2497 = vtanh.f32 %v657_v0 }
 0x5b7   :  { %v2498_v4 = vpop.eup %2497 }
 0x5b8   :  { %v661_v5 = vmul.f32 0.5, %v2498_v4 }
 0x5ba   :  { %v662_v7 = vadd.f32 0.5, %v661_v5 }
 0x5bc   :  { %v663_v8 = vsel %vm2796_vm8, %v2498_v4, %v662_v7 }
 0x5bd   :  { %666 = vrot.lane.b32.xlu0 %v663_v8, %s2609_s30  ;;  %664 = vrot.lane.b32.xlu1 %v663_v8, %s2608_s1 }
 0x5c1   :  { %668 = vrot.lane.b32.xlu1 %v663_v8, %s2607_s29  ;;  %761 = vrot.lane.b32.xlu0 %v757_v11, %s2609_s30 }
 0x5c5   :  { %759 = vrot.lane.b32.xlu1 %v757_v11, %s2608_s1  ;;  %763 = vrot.lane.b32.xlu0 %v757_v11, %s2607_s29 }
 0x62f   :  { %v667_v12 = vpop.permute.xlu0 %666  ;;  %v665_v13 = vpop.permute.xlu1 %664 }
 0x630   :  { %v671_v14 = vmul.f32 %v667_v12, %v663_v8  ;;  %v670_v17 = vmul.f32 %v665_v13, %v478_v36 }
 0x632   :  { %v672_v18 = vadd.f32 %v671_v14, %v670_v17 }
 0x633   :  { %v669_v19 = vpop.permute.xlu1 %668  ;;  %v762_v20 = vpop.permute.xlu0 %761 }
 0x634   :  { %2499 = vtanh.f32 %v672_v18  ;;  %v767_v21 = vrot.slane %v762_v20, 4 }
 0x636   :  { %v769_v22 = vmul.f32 %v767_v21, %v755_v9 }
 0x637   :  { %v760_v23 = vpop.permute.xlu1 %759  ;;  %v764_v31 = vpop.permute.xlu0 %763 }
 0x638   :  { %v771_v25 = vrot.slane %v769_v22, 4  ;;  %v765_v26 = vmul.f32 %v760_v23, %v579_v46 }
 0x63a   :  { %v773_v27 = vadd.f32 %v771_v25, %v765_v26 }
 0x63c   :  { %2501 = vtanh.f32 %v773_v27 }
 0x63e   :  { %v2500_v28 = vpop.eup %2499 }
 0x63f   :  { %v674_v29 = vmul.f32 %v2500_v28, %v669_v19 }
 0x641   :  { %777 = vrot.lane.b32.xlu1 %v674_v29, %s2607_s29 }
 0x646   :  { %v2502_v30 = vpop.eup %2501 }
 0x647   :  { %v775_v32 = vmul.f32 %v2502_v30, %v764_v31 }
 0x649   :  { %2166 = vmatmul.mubr.msk.f32.vlgmr.msra.gmra.mrb[6].mxu1 %vm188_vm4, %v775_v32 }
 0x64a   :  { %2389 = vmatpush3.bf16.msra.mxu1 %v2783_v47  ;;  %2184 = vmatprep.mubr.msk.f32.mxu1 %vm2606_vm5, %v2605_v24 }
 0x64b   :  { %2390 = vmatprep.subr.bf16.mxu1 %v2604_v15 }
 0x64e   :  { %2392 = vmatpush3.bf16.msra.mxu1 %v2800_v54 }
 0x64f   :  { %2393 = vmatprep.subr.bf16.mxu1 %v2604_v15 }
 0x652   :  { %2395 = vmatpush3.bf16.msra.mxu1 %v2806_v57 }
 0x653   :  { %2396 = vmatprep.subr.bf16.mxu1 %v2604_v15 }
 0x656   :  { %2398 = vmatpush3.bf16.msra.mxu1 %v2820_v61 }
 0x657   :  { %2417 = vmatprep.subr.bf16.mxu1 %v2604_v15 }
 0x6b3   :  { %v778_v34 = vpop.permute.xlu1 %777 }
 0x6b4   :  { %v780_v35 = vsel %vm188_vm4, %v775_v32, %v778_v34 }
 0x6b5   :  { %2155 = vmatmul.mubr.msk.f32.vlgmr.msra.gmra.mrb[8].mxu0 %vm392_vm9, %v780_v35 }
 0x6b6   :  { %2401 = vmatpush3.bf16.msra.mxu0 %v2727_v16  ;;  %2195 = vmatprep.mubr.msk.f32.mxu0 %vm2606_vm5, %v2605_v24 }
 0x6b7   :  { %2402 = vmatprep.subr.bf16.mxu0 %v2604_v15 }
 0x6ba   :  { %2404 = vmatpush3.bf16.msra.mxu0 %v2749_v33 }
 0x6bb   :  { %2405 = vmatprep.subr.bf16.mxu0 %v2604_v15 }
 0x71c   :  { %v938_v36 = vpop.f32.mrb[6].mxu1 }
 0x71d   :  { %v2167_v37 = vpop.f32.mrb[7].mxu1  ;;  %v943_v38 = vrot.slane %v938_v36, 2 }
 0x71f   :  { %v945_v39 = vadd.f32 %v943_v38, %v2774_v43 }
 0x721   :  { %2503 = vtanh.f32 %v945_v39 }
 0x72b   :  { %v2504_v45 = vpop.eup %2503 }
 0x72c   :  { %v947_v46 = vmul.f32 0.5, %v2504_v45 }
 0x72e   :  { %v948_v50 = vadd.f32 0.5, %v947_v46 }
 0x730   :  { %v949_v55 = vsel %vm2796_vm8, %v2504_v45, %v948_v50 }
 0x731   :  { %v951_v43 = vrot.slane %v949_v55, 6 }
 0x788   :  { %v850_v40 = vpop.f32.mrb[8].mxu0 }
 0x789   :  { %v851_v42 = vadd.f32 %v2852_v10, %v850_v40  ;;  %v2156_v44 = vpop.f32.mrb[9].mxu0 }
 0x78b   :  { %2505 = vtanh.f32 %v851_v42 }
 0x795   :  { %v2506_v48 = vpop.eup %2505 }
 0x796   :  { %v855_v49 = vmul.f32 0.5, %v2506_v48 }
 0x798   :  { %v856_v51 = vadd.f32 0.5, %v855_v49 }
 0x79a   :  { %v857_v52 = vsel %vm2796_vm8, %v2506_v48, %v856_v51 }
 0x79b   :  { %860 = vrot.lane.b32.xlu1 %v857_v52, %s2609_s30  ;;  %858 = vrot.lane.b32.xlu0 %v857_v52, %s2608_s1 }
 0x79f   :  { %955 = vrot.lane.b32.xlu1 %v951_v43, %s2609_s30  ;;  %862 = vrot.lane.b32.xlu0 %v857_v52, %s2607_s29 }
 0x7a3   :  { %957 = vrot.lane.b32.xlu1 %v951_v43, %s2607_s29  ;;  %953 = vrot.lane.b32.xlu0 %v951_v43, %s2608_s1 }
 0x80d   :  { %v861_v56 = vpop.permute.xlu1 %860  ;;  %v859_v58 = vpop.permute.xlu0 %858 }
 0x80e   :  { %v865_v59 = vmul.f32 %v861_v56, %v857_v52  ;;  %v864_v60 = vmul.f32 %v859_v58, %v672_v18 }
 0x810   :  { %v866_v62 = vadd.f32 %v865_v59, %v864_v60 }
 0x811   :  { %v956_v63 = vpop.permute.xlu1 %955  ;;  %v863_v0 = vpop.permute.xlu0 %862 }
 0x812   :  { %2507 = vtanh.f32 %v866_v62  ;;  %v961_v1 = vrot.slane %v956_v63, 2 }
 0x814   :  { %v963_v2 = vmul.f32 %v961_v1, %v949_v55 }
 0x815   :  { %v954_v3 = vpop.permute.xlu0 %953  ;;  %v958_v11 = vpop.permute.xlu1 %957 }
 0x816   :  { %v965_v4 = vrot.slane %v963_v2, 6  ;;  %v959_v5 = vmul.f32 %v954_v3, %v773_v27 }
 0x818   :  { %v967_v6 = vadd.f32 %v965_v4, %v959_v5 }
 0x81a   :  { %2509 = vtanh.f32 %v967_v6 }
 0x81c   :  { %v2508_v7 = vpop.eup %2507 }
 0x81d   :  { %v868_v8 = vmul.f32 %v2508_v7, %v863_v0 }
 0x81f   :  { %971 = vrot.lane.b32.xlu0 %v868_v8, %s2607_s29 }
 0x824   :  { %v2510_v9 = vpop.eup %2509 }
 0x825   :  { %v969_v12 = vmul.f32 %v2510_v9, %v958_v11 }
 0x827   :  { %2196 = vmatmul.mubr.msk.f32.vlgmr.msra.gmra.mrb[10].mxu0 %vm188_vm4, %v969_v12 }
 0x828   :  { %2407 = vmatpush3.bf16.msra.mxu0 %v2783_v47  ;;  %2214 = vmatprep.mubr.msk.f32.mxu0 %vm2606_vm5, %v2605_v24 }
 0x829   :  { %2408 = vmatprep.subr.bf16.mxu0 %v2604_v15 }
 0x82c   :  { %2410 = vmatpush3.bf16.msra.mxu0 %v2800_v54 }
 0x82d   :  { %2411 = vmatprep.subr.bf16.mxu0 %v2604_v15 }
 0x830   :  { %2413 = vmatpush3.bf16.msra.mxu0 %v2806_v57 }
 0x831   :  { %2414 = vmatprep.subr.bf16.mxu0 %v2604_v15 }
 0x834   :  { %2416 = vmatpush3.bf16.msra.mxu0 %v2820_v61 }
 0x835   :  { %2435 = vmatprep.subr.bf16.mxu0 %v2604_v15 }
 0x891   :  { %v972_v13 = vpop.permute.xlu0 %971 }
 0x892   :  { %v974_v14 = vsel %vm188_vm4, %v969_v12, %v972_v13 }
 0x893   :  { %2185 = vmatmul.mubr.msk.f32.vlgmr.msra.gmra.mrb[8].mxu1 %vm392_vm9, %v974_v14 }
 0x894   :  { %2419 = vmatpush3.bf16.msra.mxu1 %v2727_v16  ;;  %2225 = vmatprep.mubr.msk.f32.mxu1 %vm2606_vm5, %v2605_v24 }
 0x895   :  { %2420 = vmatprep.subr.bf16.mxu1 %v2604_v15 }
 0x898   :  { %2422 = vmatpush3.bf16.msra.mxu1 %v2749_v33 }
 0x899   :  { %2423 = vmatprep.subr.bf16.mxu1 %v2604_v15 }
 0x8fa   :  { %v1132_v17 = vpop.f32.mrb[10].mxu0 }
 0x8fb   :  { %v2197_v18 = vpop.f32.mrb[11].mxu0  ;;  %v1136_v19 = vadd.f32 %v1132_v17, %v2772_v41 }
 0x8fd   :  { %2511 = vtanh.f32 %v1136_v19 }
 0x907   :  { %v2512_v23 = vpop.eup %2511 }
 0x908   :  { %v1138_v27 = vmul.f32 0.5, %v2512_v23 }
 0x90a   :  { %v1139_v30 = vadd.f32 0.5, %v1138_v27 }
 0x90c   :  { %v1140_v31 = vsel %vm2796_vm8, %v2512_v23, %v1139_v30 }
 0x966   :  { %v1044_v20 = vpop.f32.mrb[8].mxu1 }
 0x967   :  { %v1045_v21 = vadd.f32 %v2852_v10, %v1044_v20  ;;  %v2186_v22 = vpop.f32.mrb[9].mxu1 }
 0x969   :  { %2513 = vtanh.f32 %v1045_v21 }
 0x973   :  { %v2514_v25 = vpop.eup %2513 }
 0x974   :  { %v1049_v26 = vmul.f32 0.5, %v2514_v25 }
 0x976   :  { %v1050_v28 = vadd.f32 0.5, %v1049_v26 }
 0x978   :  { %v1051_v29 = vsel %vm2796_vm8, %v2514_v25, %v1050_v28 }
 0x979   :  { %1054 = vrot.lane.b32.xlu0 %v1051_v29, %s2609_s30  ;;  %1052 = vrot.lane.b32.xlu1 %v1051_v29, %s2608_s1 }
 0x97d   :  { %1056 = vrot.lane.b32.xlu1 %v1051_v29, %s2607_s29  ;;  %1141 = vrot.lane.b32.xlu0 %v1140_v31, %s2608_s1 }
 0x981   :  { %1143 = vrot.lane.b32.xlu1 %v1140_v31, %s2609_s30  ;;  %1145 = vrot.lane.b32.xlu0 %v1140_v31, %s2607_s29 }
 0x9eb   :  { %v1055_v32 = vpop.permute.xlu0 %1054  ;;  %v1053_v34 = vpop.permute.xlu1 %1052 }
 0x9ec   :  { %v1059_v35 = vmul.f32 %v1055_v32, %v1051_v29  ;;  %v1058_v36 = vmul.f32 %v1053_v34, %v866_v62 }
 0x9ee   :  { %v1060_v37 = vadd.f32 %v1059_v35, %v1058_v36 }
 0x9ef   :  { %v1057_v38 = vpop.permute.xlu1 %1056  ;;  %v1142_v39 = vpop.permute.xlu0 %1141 }
 0x9f0   :  { %2515 = vtanh.f32 %v1060_v37  ;;  %v1147_v42 = vmul.f32 %v1142_v39, %v967_v6 }
 0x9f3   :  { %v1144_v40 = vpop.permute.xlu1 %1143  ;;  %v1146_v50 = vpop.permute.xlu0 %1145 }
 0x9f4   :  { %v1148_v44 = vmul.f32 %v1144_v40, %v1140_v31 }
 0x9f6   :  { %v1149_v45 = vadd.f32 %v1148_v44, %v1147_v42 }
 0x9f8   :  { %2517 = vtanh.f32 %v1149_v45 }
 0x9fa   :  { %v2516_v46 = vpop.eup %2515 }
 0x9fb   :  { %v1062_v48 = vmul.f32 %v2516_v46, %v1057_v38 }
 0x9fd   :  { %1153 = vrot.lane.b32.xlu1 %v1062_v48, %s2607_s29 }
 0xa02   :  { %v2518_v49 = vpop.eup %2517 }
 0xa03   :  { %v1151_v51 = vmul.f32 %v2518_v49, %v1146_v50 }
 0xa05   :  { %2226 = vmatmul.mubr.msk.f32.vlgmr.msra.gmra.mrb[10].mxu1 %vm188_vm4, %v1151_v51 }
 0xa06   :  { %2425 = vmatpush3.bf16.msra.mxu1 %v2783_v47  ;;  %2244 = vmatprep.mubr.msk.f32.mxu1 %vm2606_vm5, %v2605_v24 }
 0xa07   :  { %2426 = vmatprep.subr.bf16.mxu1 %v2604_v15 }
 0xa0a   :  { %2428 = vmatpush3.bf16.msra.mxu1 %v2800_v54 }
 0xa0b   :  { %2429 = vmatprep.subr.bf16.mxu1 %v2604_v15 }
 0xa0e   :  { %2431 = vmatpush3.bf16.msra.mxu1 %v2806_v57 }
 0xa0f   :  { %2432 = vmatprep.subr.bf16.mxu1 %v2604_v15 }
 0xa12   :  { %2434 = vmatpush3.bf16.msra.mxu1 %v2820_v61 }
 0xa13   :  { %2453 = vmatprep.subr.bf16.mxu1 %v2604_v15 }
 0xa6f   :  { %v1154_v52 = vpop.permute.xlu1 %1153 }
 0xa70   :  { %v1156_v55 = vsel %vm188_vm4, %v1151_v51, %v1154_v52 }
 0xa71   :  { %2215 = vmatmul.mubr.msk.f32.vlgmr.msra.gmra.mrb[12].mxu0 %vm392_vm9, %v1156_v55 }
 0xa72   :  { %2437 = vmatpush3.bf16.msra.mxu0 %v2727_v16  ;;  %2255 = vmatprep.mubr.msk.f32.mxu0 %vm2606_vm5, %v2605_v24 }
 0xa73   :  { %2438 = vmatprep.subr.bf16.mxu0 %v2604_v15 }
 0xa76   :  { %2440 = vmatpush3.bf16.msra.mxu0 %v2749_v33 }
 0xa77   :  { %2441 = vmatprep.subr.bf16.mxu0 %v2604_v15 }
 0xad8   :  { %v1314_v43 = vpop.f32.mrb[10].mxu1 }
 0xad9   :  { %v2227_v56 = vpop.f32.mrb[11].mxu1  ;;  %v1319_v58 = vrot.slane %v1314_v43, 6 }
 0xadb   :  { %v1321_v59 = vadd.f32 %v1319_v58, %v2772_v41 }
 0xadd   :  { %2519 = vtanh.f32 %v1321_v59 }
 0xae7   :  { %v2520_v0 = vpop.eup %2519 }
 0xae8   :  { %v1323_v1 = vmul.f32 0.5, %v2520_v0 }
 0xaea   :  { %v1324_v4 = vadd.f32 0.5, %v1323_v1 }
 0xaec   :  { %v1325_v7 = vsel %vm2796_vm8, %v2520_v0, %v1324_v4 }
 0xaed   :  { %v1327_v8 = vrot.slane %v1325_v7, 2 }
 0xb44   :  { %v1226_v60 = vpop.f32.mrb[12].mxu0 }
 0xb45   :  { %v1227_v62 = vadd.f32 %v2852_v10, %v1226_v60  ;;  %v2216_v63 = vpop.f32.mrb[13].mxu0 }
 0xb47   :  { %2521 = vtanh.f32 %v1227_v62 }
 0xb51   :  { %v2522_v2 = vpop.eup %2521 }
 0xb52   :  { %v1231_v3 = vmul.f32 0.5, %v2522_v2 }
 0xb54   :  { %v1232_v5 = vadd.f32 0.5, %v1231_v3 }
 0xb56   :  { %v1233_v6 = vsel %vm2796_vm8, %v2522_v2, %v1232_v5 }
 0xb57   :  { %1236 = vrot.lane.b32.xlu1 %v1233_v6, %s2609_s30  ;;  %1234 = vrot.lane.b32.xlu0 %v1233_v6, %s2608_s1 }
 0xb5b   :  { %1331 = vrot.lane.b32.xlu1 %v1327_v8, %s2609_s30  ;;  %1238 = vrot.lane.b32.xlu0 %v1233_v6, %s2607_s29 }
 0xb5f   :  { %1333 = vrot.lane.b32.xlu1 %v1327_v8, %s2607_s29  ;;  %1329 = vrot.lane.b32.xlu0 %v1327_v8, %s2608_s1 }
 0xbc9   :  { %v1237_v9 = vpop.permute.xlu1 %1236  ;;  %v1235_v11 = vpop.permute.xlu0 %1234 }
 0xbca   :  { %v1241_v12 = vmul.f32 %v1237_v9, %v1233_v6  ;;  %v1240_v13 = vmul.f32 %v1235_v11, %v1060_v37 }
 0xbcc   :  { %v1242_v14 = vadd.f32 %v1241_v12, %v1240_v13 }
 0xbcd   :  { %v1332_v17 = vpop.permute.xlu1 %1331  ;;  %v1239_v18 = vpop.permute.xlu0 %1238 }
 0xbce   :  { %2523 = vtanh.f32 %v1242_v14  ;;  %v1337_v19 = vrot.slane %v1332_v17, 6 }
 0xbd0   :  { %v1339_v20 = vmul.f32 %v1337_v19, %v1325_v7 }
 0xbd1   :  { %v1330_v21 = vpop.permute.xlu0 %1329  ;;  %v1334_v29 = vpop.permute.xlu1 %1333 }
 0xbd2   :  { %v1341_v22 = vrot.slane %v1339_v20, 2  ;;  %v1335_v23 = vmul.f32 %v1330_v21, %v1149_v45 }
 0xbd4   :  { %v1343_v25 = vadd.f32 %v1341_v22, %v1335_v23 }
 0xbd6   :  { %2525 = vtanh.f32 %v1343_v25 }
 0xbd8   :  { %v2524_v26 = vpop.eup %2523 }
 0xbd9   :  { %v1244_v27 = vmul.f32 %v2524_v26, %v1239_v18 }
 0xbdb   :  { %1347 = vrot.lane.b32.xlu0 %v1244_v27, %s2607_s29 }
 0xbe0   :  { %v2526_v28 = vpop.eup %2525 }
 0xbe1   :  { %v1345_v30 = vmul.f32 %v2526_v28, %v1334_v29 }
 0xbe3   :  { %2256 = vmatmul.mubr.msk.f32.vlgmr.msra.gmra.mrb[14].mxu0 %vm188_vm4, %v1345_v30 }
 0xbe4   :  { %2443 = vmatpush3.bf16.msra.mxu0 %v2783_v47  ;;  %2274 = vmatprep.mubr.msk.f32.mxu0 %vm2606_vm5, %v2605_v24 }
 0xbe5   :  { %2444 = vmatprep.subr.bf16.mxu0 %v2604_v15 }
 0xbe8   :  { %2446 = vmatpush3.bf16.msra.mxu0 %v2800_v54 }
 0xbe9   :  { %2447 = vmatprep.subr.bf16.mxu0 %v2604_v15 }
 0xbec   :  { %2449 = vmatpush3.bf16.msra.mxu0 %v2806_v57 }
 0xbed   :  { %2450 = vmatprep.subr.bf16.mxu0 %v2604_v15 }
 0xbf0   :  { %2452 = vmatpush3.bf16.msra.mxu0 %v2820_v61 }
 0xc4d   :  { %v1348_v31 = vpop.permute.xlu0 %1347 }
 0xc4e   :  { %v1350_v32 = vsel %vm188_vm4, %v1345_v30, %v1348_v31 }
 0xc4f   :  { %2245 = vmatmul.mubr.msk.f32.vlgmr.msra.gmra.mrb[12].mxu1 %vm392_vm9, %v1350_v32 }
 0xc50   :  { %2455 = vmatpush3.bf16.msra.mxu1 %v2727_v16  ;;  %2285 = vmatprep.mubr.msk.f32.mxu1 %vm2606_vm5, %v2605_v24 }
 0xc51   :  { %2456 = vmatprep.subr.bf16.mxu1 %v2604_v15 }
 0xc54   :  { %2458 = vmatpush3.bf16.msra.mxu1 %v2749_v33 }
 0xc55   :  { %2459 = vmatprep.subr.bf16.mxu1 %v2604_v15 }
 0xcb6   :  { %v1508_v34 = vpop.f32.mrb[14].mxu0 }
 0xcb7   :  { %v2257_v35 = vpop.f32.mrb[15].mxu0  ;;  %v1513_v36 = vrot.slane %v1508_v34, 4 }
 0xcb9   :  { %v1515_v37 = vadd.f32 %v1513_v36, %v2772_v41 }
 0xcbb   :  { %2527 = vtanh.f32 %v1515_v37 }
 0xcc5   :  { %v2528_v16 = vpop.eup %2527 }
 0xcc6   :  { %v1517_v42 = vmul.f32 0.5, %v2528_v16 }
 0xcc8   :  { %v1518_v46 = vadd.f32 0.5, %v1517_v42 }
 0xcca   :  { %v1519_v49 = vsel %vm2796_vm8, %v2528_v16, %v1518_v46 }
 0xccb   :  { %v1521_v50 = vrot.slane %v1519_v49, 4 }
 0xd22   :  { %v1420_v38 = vpop.f32.mrb[12].mxu1 }
 0xd23   :  { %v1421_v39 = vadd.f32 %v2852_v10, %v1420_v38  ;;  %v2246_v40 = vpop.f32.mrb[13].mxu1 }
 0xd25   :  { %2529 = vtanh.f32 %v1421_v39 }
 0xd2f   :  { %v2530_v44 = vpop.eup %2529 }
 0xd30   :  { %v1425_v45 = vmul.f32 0.5, %v2530_v44 }
 0xd32   :  { %v1426_v48 = vadd.f32 0.5, %v1425_v45 }
 0xd34   :  { %v1427_v33 = vsel %vm2796_vm8, %v2530_v44, %v1426_v48 }
 0xd35   :  { %1430 = vrot.lane.b32.xlu0 %v1427_v33, %s2609_s30  ;;  %1428 = vrot.lane.b32.xlu1 %v1427_v33, %s2608_s1 }
 0xd39   :  { %1432 = vrot.lane.b32.xlu1 %v1427_v33, %s2607_s29  ;;  %1525 = vrot.lane.b32.xlu0 %v1521_v50, %s2609_s30 }
 0xd3d   :  { %1523 = vrot.lane.b32.xlu1 %v1521_v50, %s2608_s1  ;;  %1527 = vrot.lane.b32.xlu0 %v1521_v50, %s2607_s29 }
 0xda7   :  { %v1431_v51 = vpop.permute.xlu0 %1430  ;;  %v1429_v52 = vpop.permute.xlu1 %1428 }
 0xda8   :  { %v1435_v55 = vmul.f32 %v1431_v51, %v1427_v33  ;;  %v1434_v43 = vmul.f32 %v1429_v52, %v1242_v14 }
 0xdaa   :  { %v1436_v56 = vadd.f32 %v1435_v55, %v1434_v43 }
 0xdab   :  { %v1433_v58 = vpop.permute.xlu1 %1432  ;;  %v1526_v59 = vpop.permute.xlu0 %1525 }
 0xdac   :  { %2531 = vtanh.f32 %v1436_v56  ;;  %v1531_v60 = vrot.slane %v1526_v59, 4 }
 0xdae   :  { %v1533_v62 = vmul.f32 %v1531_v60, %v1519_v49 }
 0xdaf   :  { %v1524_v63 = vpop.permute.xlu1 %1523  ;;  %v1528_v6 = vpop.permute.xlu0 %1527 }
 0xdb0   :  { %v1535_v0 = vrot.slane %v1533_v62, 4  ;;  %v1529_v1 = vmul.f32 %v1524_v63, %v1343_v25 }
 0xdb2   :  { %v1537_v2 = vadd.f32 %v1535_v0, %v1529_v1 }
 0xdb4   :  { %2533 = vtanh.f32 %v1537_v2 }
 0xdb6   :  { %v2532_v3 = vpop.eup %2531 }
 0xdb7   :  { %v1438_v4 = vmul.f32 %v2532_v3, %v1433_v58 }
 0xdb9   :  { %1541 = vrot.lane.b32.xlu1 %v1438_v4, %s2607_s29 }
 0xdbe   :  { %v2534_v5 = vpop.eup %2533 }
 0xdbf   :  { %v1539_v7 = vmul.f32 %v2534_v5, %v1528_v6  ;;  %v1910_v6 = vld [vmem:[#allocation2] ss:$0 sm:$0xff] }
 0xdc1   :  { %2286 = vmatmul.mubr.msk.f32.vlgmr.msra.gmra.mrb[14].mxu1 %vm188_vm4, %v1539_v7 }
 0xdc2   :  { %2461 = vmatpush3.bf16.msra.mxu1 %v2783_v47  ;;  %2304 = vmatprep.mubr.msk.f32.mxu1 %vm2606_vm5, %v2605_v24 }
 0xdc3   :  { %2462 = vmatprep.subr.bf16.mxu1 %v2604_v15 }
 0xdc6   :  { %2464 = vmatpush3.bf16.msra.mxu1 %v2800_v54 }
 0xdc7   :  { %2465 = vmatprep.subr.bf16.mxu1 %v2604_v15 }
 0xdca   :  { %2467 = vmatpush3.bf16.msra.mxu1 %v2806_v57 }
 0xdcb   :  { %2468 = vmatprep.subr.bf16.mxu1 %v2604_v15 }
 0xdce   :  { %2470 = vmatpush3.bf16.msra.mxu1 %v2820_v61 }
 0xe2b   :  { %v1542_v8 = vpop.permute.xlu1 %1541 }
 0xe2c   :  { %v1544_v9 = vsel %vm188_vm4, %v1539_v7, %v1542_v8 }
 0xe2d   :  { %2275 = vmatmul.mubr.msk.f32.vlgmr.msra.gmra.mrb[16].mxu0 %vm392_vm9, %v1544_v9 }
 0xe94   :  { %v1702_v47 = vpop.f32.mrb[14].mxu1 }
 0xe95   :  { %v2287_v11 = vpop.f32.mrb[15].mxu1  ;;  %v1707_v24 = vrot.slane %v1702_v47, 2 }
 0xe97   :  { %v1709_v12 = vadd.f32 %v1707_v24, %v2772_v41 }
 0xe99   :  { %2535 = vtanh.f32 %v1709_v12 }
 0xea3   :  { %v2536_v57 = vpop.eup %2535 }
 0xea4   :  { %v1711_v15 = vmul.f32 0.5, %v2536_v57 }
 0xea6   :  { %v1712_v18 = vadd.f32 0.5, %v1711_v15 }
 0xea8   :  { %v1713_v21 = vsel %vm2796_vm8, %v2536_v57, %v1712_v18 }
 0xea9   :  { %v1715_v41 = vrot.slane %v1713_v21, 6 }
 0xf00   :  { %v1614_v54 = vpop.f32.mrb[16].mxu0 }
 0xf01   :  { %v1615_v13 = vadd.f32 %v2852_v10, %v1614_v54  ;;  %v2276_v14 = vpop.f32.mrb[17].mxu0 }
 0xf03   :  { %2537 = vtanh.f32 %v1615_v13 }
 0xf0d   :  { %v2538_v17 = vpop.eup %2537 }
 0xf0e   :  { %v1619_v61 = vmul.f32 0.5, %v2538_v17 }
 0xf10   :  { %v1620_v19 = vadd.f32 0.5, %v1619_v61 }
 0xf12   :  { %v1621_v20 = vsel %vm2796_vm8, %v2538_v17, %v1620_v19 }
 0xf13   :  { %1624 = vrot.lane.b32.xlu1 %v1621_v20, %s2609_s30  ;;  %1622 = vrot.lane.b32.xlu0 %v1621_v20, %s2608_s1 }
 0xf17   :  { %1719 = vrot.lane.b32.xlu1 %v1715_v41, %s2609_s30  ;;  %1626 = vrot.lane.b32.xlu0 %v1621_v20, %s2607_s29 }
 0xf1b   :  { %1721 = vrot.lane.b32.xlu1 %v1715_v41, %s2607_s29  ;;  %1717 = vrot.lane.b32.xlu0 %v1715_v41, %s2608_s1 }
 0xf85   :  { %v1625_v22 = vpop.permute.xlu1 %1624  ;;  %v1623_v23 = vpop.permute.xlu0 %1622 }
 0xf86   :  { %v1629_v25 = vmul.f32 %v1625_v22, %v1621_v20  ;;  %v1628_v26 = vmul.f32 %v1623_v23, %v1436_v56 }
 0xf88   :  { %v1630_v27 = vadd.f32 %v1629_v25, %v1628_v26 }
 0xf89   :  { %v1627_v29 = vpop.permute.xlu0 %1626  ;;  %v1720_v31 = vpop.permute.xlu1 %1719 }
 0xf8a   :  { %2539 = vtanh.f32 %v1630_v27  ;;  %v1725_v32 = vrot.slane %v1720_v31, 2 }
 0xf8c   :  { %v1727_v34 = vmul.f32 %v1725_v32, %v1713_v21 }
 0xf8d   :  { %v1718_v35 = vpop.permute.xlu0 %1717  ;;  %v1722_v40 = vpop.permute.xlu1 %1721 }
 0xf8e   :  { %v1729_v36 = vrot.slane %v1727_v34, 6  ;;  %v1723_v37 = vmul.f32 %v1718_v35, %v1537_v2 }
 0xf90   :  { %v1731_v38 = vadd.f32 %v1729_v36, %v1723_v37 }
 0xf92   :  { %2541 = vtanh.f32 %v1731_v38 }
 0xf94   :  { %v2540_v28 = vpop.eup %2539 }
 0xf95   :  { %v1632_v30 = vmul.f32 %v2540_v28, %v1627_v29 }
 0xf97   :  { %1735 = vrot.lane.b32.xlu0 %v1632_v30, %s2607_s29 }
 0xf9c   :  { %v2542_v39 = vpop.eup %2541 }
 0xf9d   :  { %v1733_v16 = vmul.f32 %v2542_v39, %v1722_v40 }
0x1009   :  { %v1736_v42 = vpop.permute.xlu0 %1735 }
0x100a   :  { %v1738_v44 = vsel %vm188_vm4, %v1733_v16, %v1736_v42 }
0x100b   :  { %2305 = vmatmul.mubr.msk.f32.vlgmr.msra.gmra.mrb[16].mxu1 %vm392_vm9, %v1738_v44 }
0x10de   :  { %v1808_v45 = vpop.f32.mrb[16].mxu1 }
0x10df   :  { %v1809_v46 = vadd.f32 %v2852_v10, %v1808_v45  ;;  %v2306_v48 = vpop.f32.mrb[17].mxu1 }
0x10e1   :  { %2543 = vtanh.f32 %v1809_v46 }
0x10eb   :  { %v2544_v33 = vpop.eup %2543 }
0x10ec   :  { %v1813_v49 = vmul.f32 0.5, %v2544_v33 }
0x10ee   :  { %v1814_v50 = vadd.f32 0.5, %v1813_v49 }
0x10f0   :  { %v1815_v51 = vsel %vm2796_vm8, %v2544_v33, %v1814_v50 }
0x10f1   :  { %1818 = vrot.lane.b32.xlu0 %v1815_v51, %s2609_s30  ;;  %1816 = vrot.lane.b32.xlu1 %v1815_v51, %s2608_s1 }
0x10f5   :  { %1820 = vrot.lane.b32.xlu1 %v1815_v51, %s2607_s29 }
0x10f9   :  { %1828 = vrot.lane.b32.xlu1 %v1731_v38, %s2607_s29 }
0x1163   :  { %v1819_v52 = vpop.permute.xlu0 %1818  ;;  %v1817_v55 = vpop.permute.xlu1 %1816 }
0x1164   :  { %v1823_v43 = vmul.f32 %v1819_v52, %v1815_v51  ;;  %v1822_v10 = vmul.f32 %v1817_v55, %v1630_v27 }
0x1166   :  { %v1824_v56 = vadd.f32 %v1823_v43, %v1822_v10 }
0x1167   :  { %v1821_v59 = vpop.permute.xlu1 %1820 }
0x1168   :  { %2545 = vtanh.f32 %v1824_v56 }
0x116b   :  { %v1829_v0 = vpop.permute.xlu1 %1828 }
0x116c   :  { %v1839_v2 = vsel %vm188_vm4, %v1733_v16, %v1829_v0 }
0x1172   :  { %v2546_v58 = vpop.eup %2545 }
0x1173   :  { %v1826_v60 = vmul.f32 %v2546_v58, %v1821_v59 }
0x1175   :  { %1832 = vrot.lane.b32.xlu1 %v1826_v60, %s2609_s30  ;;  %v1851_v62 = vmul.f32 %v1909_v53, %v1826_v60 }
0x1177   :  { %v1853_v63 = vsel %vm1852_vm10, %v1851_v62, 0.0 }
0x1178   :  { %1854 = vadd.xlane.f32.xlu0 %v1853_v63 }
0x1179   :  { %1836 = vrot.lane.b32.xlu1 %v1824_v56, %s2608_s1 }
0x11e7   :  { %v1833_v1 = vpop.permute.xlu1 %1832 }
0x11e8   :  { %v1840_v3 = vsel %vm392_vm9, %v1839_v2, %v1833_v1 }
0x11eb   :  { %v1837_v4 = vpop.permute.xlu1 %1836 }
0x11ec   :  { %v1842_v5 = vsel %vm1841_vm11, %v1840_v3, %v1837_v4 }
0x11ed   :  { %1843 = vst [vmem:[%s3087_s11] sm:$0x3] %v1842_v5 }
0x1205   :  { %v1855_v7 = vpop.xlane.xlu0 %1854 }
0x1206   :  { %v1863_v8 = vadd.f32 %v1910_v6, %v1855_v7 }
0x1208   :  { %v1911_v9 = vmul.f32 -1.442695, %v1863_v8 }
0x120a   :  { %2547 = vpow2.f32 %v1911_v9 }
0x1214   :  { %v2548_v47 = vpop.eup %2547 }
0x1215   :  { %v1867_v11 = vadd.f32 1.0, %v2548_v47 }
0x1217   :  { %2549 = vrcp.f32 %v1867_v11 }
0x1221   :  { %v2550_v24 = vpop.eup %2549 }
0x1222   :  { %1871 = vst.msk [vmem:[%s3088_s12] sm:$0x3] %vm1870_vm12, %v2550_v24 }
0x1223   :  { %1880 = vsyncpa [#allocation4], 1 }
0x1224   :  { %1881 = vsyncpa [#allocation6], 1 }

</bundles_post_ra>
